<compile_context>
chip_gen: v7x
topology: tpu7x:2x2x1
jax: 0.10.0
libtpu: 0.0.40
codegen_flags: <defaults>
</compile_context>

<pallas_src>
import functools

import jax
import jax.numpy as jnp
from jax.experimental import pallas as pl
from jax.experimental.pallas import tpu as pltpu


def _round_up(n, m):
    return ((n + m - 1) // m) * m


def _lstm_kernel(x_ref,      # (T*BP, I)  bf16  time-major input, batch padded, pre-flattened
                 wih0_ref,   # (I, G)     bf16  layer-0 input weights (transposed), G = 4H
                 whh0_ref,   # (G, G)     bf16  layer-0 hidden weights, rows >= H are zero
                 b0_ref,     # (1, G)     f32   b_ih0 + b_hh0
                 w1s_ref,    # (2G, G)    bf16  vstack([wih1, whh1]), rows >= H of each half zero
                 b1_ref,     # (1, G)     f32   b_ih1 + b_hh1
                 wfc_ref,    # (G, OP)    bf16  fc weight, rows >= H / cols >= O are zero
                 bfc_ref,    # (1, OP)    f32
                 out_ref):   # (BP, OP)   f32
    BP = out_ref.shape[0]
    G = whh0_ref.shape[1]          # 4H (128 for H=32: one vreg of lanes)
    H = G // 4
    T = x_ref.shape[0] // BP
    f32, bf16 = jnp.float32, jnp.bfloat16

    # Lane mask selecting the 'g' gate block [2H, 3H) -- built once, reused.
    lane = jax.lax.broadcasted_iota(jnp.int32, (BP, G), 1)
    g_mask = jnp.logical_and(lane >= 2 * H, lane < 3 * H)

    def activate(g_lin):
        # Single EUP pass: tanh on the 'g' block, sigmoid elsewhere via
        # sigmoid(x) = 0.5*(1 + tanh(x/2))  (exact; only rounding differs).
        pre = jnp.where(g_mask, g_lin, 0.5 * g_lin)
        t = jnp.tanh(pre)
        return jnp.where(g_mask, t, 0.5 * t + 0.5)

    def cell(g_lin, c, first):
        # g_lin: (BP, G) f32 pre-activations, gate blocks [i|f|g|o] along lanes.
        act = activate(g_lin)
        i_g = act * pltpu.roll(act, G - 2 * H, axis=1)     # i*g in lanes [0, H)
        if first:                                          # c == 0 at t=0
            c_new = i_g
        else:
            f_al = pltpu.roll(act, G - H, axis=1)          # f -> lanes [0, H)
            c_new = f_al * c + i_g
        o_al = pltpu.roll(act, G - 3 * H, axis=1)          # o -> lanes [0, H)
        h_new = o_al * jnp.tanh(c_new)                     # lanes [0, H) valid;
        return h_new, c_new                                # junk lanes killed by
                                                           # zero weight rows.

    # ---- Hoisted layer-0 input projection: one (T*BP, I) x (I, G) matmul ----
    xw0 = jnp.dot(x_ref[...], wih0_ref[...], preferred_element_type=f32) + b0_ref[...]

    whh0 = whh0_ref[...]
    w1s = w1s_ref[...]
    b1 = jnp.broadcast_to(b1_ref[...], (BP, G))            # hoisted broadcast
    zeros = jnp.zeros((BP, G), f32)
    h0, c0, h1, c1 = zeros, zeros, zeros, zeros

    # ---- Interleaved (wavefront) recurrences, statically unrolled (T=8) ----
    # Layer-0 step t+1 depends only on h0_t; layer-1 step t depends on h0_t and
    # h1_{t-1}; emitting them back-to-back gives the scheduler two independent
    # chains to overlap.
    for t in range(T):
        xw0_t = xw0[t * BP:(t + 1) * BP, :]
        if t == 0:
            g0 = xw0_t                                     # h0 == 0: skip h@Whh
        else:
            g0 = xw0_t + jnp.dot(h0.astype(bf16), whh0, preferred_element_type=f32)
        h0, c0 = cell(g0, c0, first=(t == 0))

        if t == 0:
            # h1 == 0: only the input-projection half of the stacked weight matters.
            g1 = jnp.dot(h0.astype(bf16), w1s[:G, :], preferred_element_type=f32) + b1
        else:
            # K=256 fold: [h0_t | h1_t] @ [wih1 ; whh1] -> one MXU push (v6e/v7x depth).
            h01 = jnp.concatenate([h0.astype(bf16), h1.astype(bf16)], axis=1)
            g1 = jnp.dot(h01, w1s, preferred_element_type=f32) + b1
        h1, c1 = cell(g1, c1, first=(t == 0))

    # ---- Final Linear on the last timestep (lane-dense padded output) ----
    out_ref[...] = (jnp.dot(h1.astype(bf16), wfc_ref[...],
                            preferred_element_type=f32) + bfc_ref[...])


def init_params(key, input_size, hidden_size, output_size):
    """Deterministic synthetic parameters, same shapes/semantics as nn.LSTM / nn.Linear
    (pre-transposed: wih* are (in, 4H), whh* are (H, 4H), wfc is (H, O))."""
    H, I, O = hidden_size, input_size, output_size
    ks = jax.random.split(key, 10)
    scale = 1.0 / jnp.sqrt(H)

    def u(k, shape):
        return jax.random.uniform(k, shape, jnp.float32, -scale, scale)

    return {
        "wih0": u(ks[0], (I, 4 * H)),
        "whh0": u(ks[1], (H, 4 * H)),
        "b0":   u(ks[2], (1, 4 * H)) + u(ks[3], (1, 4 * H)),   # b_ih + b_hh
        "wih1": u(ks[4], (H, 4 * H)),
        "whh1": u(ks[5], (H, 4 * H)),
        "b1":   u(ks[6], (1, 4 * H)) + u(ks[7], (1, 4 * H)),
        "wfc":  u(ks[8], (H, O)),
        "bfc":  u(ks[9], (1, O)),
    }


def pack_params(params):
    """Pad / zero-extend / bf16-cast the logical f32 params into the kernel layout.
    The zero rows >= H are REQUIRED by the kernel (they kill junk hidden lanes)."""
    H = params["whh0"].shape[0]
    G = 4 * H
    O = params["wfc"].shape[1]
    OP = _round_up(O, 128)
    bf16 = jnp.bfloat16

    def pad_rows(w, rows):
        return jnp.zeros((rows, w.shape[1]), w.dtype).at[: w.shape[0]].set(w)

    w1s = jnp.concatenate([pad_rows(params["wih1"], G),
                           pad_rows(params["whh1"], G)], axis=0)       # (2G, G)
    wfcp = jnp.zeros((G, OP), jnp.float32).at[:H, :O].set(params["wfc"])
    bfcp = jnp.zeros((1, OP), jnp.float32).at[:, :O].set(params["bfc"])
    return {
        "wih0": params["wih0"].astype(bf16),                 # (I, G)
        "whh0": pad_rows(params["whh0"], G).astype(bf16),    # (G, G)
        "b0":   params["b0"].astype(jnp.float32),            # (1, G)
        "w1s":  w1s.astype(bf16),                            # (2G, G)
        "b1":   params["b1"].astype(jnp.float32),            # (1, G)
        "wfc":  wfcp.astype(bf16),                           # (G, OP)
        "bfc":  bfcp,                                        # (1, OP)
    }


@functools.partial(jax.jit, static_argnames=("out_size",))
def lstm_model_forward(x, packed, *, out_size):
    """x: (B, T, I) float32; packed: output of pack_params. Returns (B, out_size)."""
    B, T, I = x.shape
    OP = packed["wfc"].shape[1]
    BP = max(8, _round_up(B, 8))

    # Time-major, batch padded to a full sublane tile, flattened to (T*BP, I)
    # and cast to bf16 here in XLA (free), so the kernel never reshapes across
    # tile boundaries and the x DMA is half-size.
    x_tm = jnp.transpose(x, (1, 0, 2))                           # (T, B, I)
    x_tm = jnp.pad(x_tm, ((0, 0), (0, BP - B), (0, 0)))          # (T, BP, I)
    x2d = x_tm.reshape(T * BP, I).astype(jnp.bfloat16)           # (T*BP, I)

    vmem = pl.BlockSpec(memory_space=pltpu.MemorySpace.VMEM)
    out_pad = pl.pallas_call(
        _lstm_kernel,
        out_shape=jax.ShapeDtypeStruct((BP, OP), jnp.float32),
        in_specs=[vmem] * 8,
        out_specs=vmem,
    )(x2d,
      packed["wih0"], packed["whh0"], packed["b0"],
      packed["w1s"], packed["b1"],
      packed["wfc"], packed["bfc"])
    return out_pad[:B, :out_size]


def _reference_forward(x, params):
    """Pure-JAX f32 reference matching PyTorch nn.LSTM semantics (validation)."""
    B, T, I = x.shape
    H = params["whh0"].shape[0]

    def cell(x_t, h, c, wih, whh, b):
        g = x_t @ wih + h @ whh + b
        i = jax.nn.sigmoid(g[:, 0 * H:1 * H])
        f = jax.nn.sigmoid(g[:, 1 * H:2 * H])
        gg = jnp.tanh(g[:, 2 * H:3 * H])
        o = jax.nn.sigmoid(g[:, 3 * H:4 * H])
        c = f * c + i * gg
        return o * jnp.tanh(c), c

    h0 = c0 = h1 = c1 = jnp.zeros((B, H), jnp.float32)
    for t in range(T):
        h0, c0 = cell(x[:, t, :], h0, c0, params["wih0"], params["whh0"], params["b0"])
        h1, c1 = cell(h0, h1, c1, params["wih1"], params["whh1"], params["b1"])
    return h1 @ params["wfc"] + params["bfc"]


if __name__ == "__main__":
    # Small shapes consistent with the module: batch=2, seq=8, input=8,
    # hidden=32, output=4, num_layers=2.
    B, T, I, H, O = 2, 8, 8, 32, 4

    key = jax.random.PRNGKey(0)
    k_x, k_p = jax.random.split(key)
    x = jax.random.normal(k_x, (B, T, I), jnp.float32)
    params = init_params(k_p, I, H, O)
    packed = pack_params(params)

    out = lstm_model_forward(x, packed, out_size=O)
    out = jax.block_until_ready(out)

    ref = _reference_forward(x, params)
    assert out.shape == (B, O)
    # bf16 MXU inputs (f32 accumulation) + tanh-form sigmoid -> small drift vs f32 reference.
    assert jnp.allclose(out, ref, atol=5e-2, rtol=5e-2), (
        f"mismatch vs reference, max abs err = {jnp.max(jnp.abs(out - ref))}")

    print("KERNEL_OK")
</pallas_src>

<mosaic_0001>
module attributes {stable_mosaic.version = 11 : i64} {
  func.func @_lstm_kernel(%arg0: memref<64x8xbf16, #tpu.memory_space<vmem>>, %arg1: memref<8x128xbf16, #tpu.memory_space<vmem>>, %arg2: memref<128x128xbf16, #tpu.memory_space<vmem>>, %arg3: memref<1x128xf32, #tpu.memory_space<vmem>>, %arg4: memref<256x128xbf16, #tpu.memory_space<vmem>>, %arg5: memref<1x128xf32, #tpu.memory_space<vmem>>, %arg6: memref<128x128xbf16, #tpu.memory_space<vmem>>, %arg7: memref<1x128xf32, #tpu.memory_space<vmem>>, %arg8: memref<8x128xf32, #tpu.memory_space<vmem>>) attributes {dimension_semantics = [], scalar_prefetch = 0 : i64, scratch_operands = 0 : i64, tpu.core_type = #tpu.core_type<tc>} {
    %0 = tpu.iota {dimensions = array<i32: 1>} : vector<8x128xi32>
    %c64_i32 = arith.constant 64 : i32
    %1 = vector.broadcast %c64_i32 : i32 to vector<8x128xi32>
    %2 = arith.cmpi sge, %0, %1 : vector<8x128xi32>
    %c96_i32 = arith.constant 96 : i32
    %3 = vector.broadcast %c96_i32 : i32 to vector<8x128xi32>
    %4 = arith.cmpi slt, %0, %3 : vector<8x128xi32>
    %5 = arith.andi %2, %4 : vector<8x128xi1>
    %c0 = arith.constant 0 : index
    %c0_0 = arith.constant 0 : index
    %6 = vector.load %arg0[%c0, %c0_0] : memref<64x8xbf16, #tpu.memory_space<vmem>>, vector<64x8xbf16>
    %c0_1 = arith.constant 0 : index
    %c0_2 = arith.constant 0 : index
    %7 = vector.load %arg1[%c0_1, %c0_2] : memref<8x128xbf16, #tpu.memory_space<vmem>>, vector<8x128xbf16>
    %cst = arith.constant dense<0.000000e+00> : vector<64x128xf32>
    %8 = tpu.matmul %6, %7, %cst {dimension_numbers = #tpu.dot_dimension_numbers<[1], [0], [0], [1], [0, 0, 1, 1], [], []>} : vector<64x8xbf16>, vector<8x128xbf16>, vector<64x128xf32> -> vector<64x128xf32>
    %c0_3 = arith.constant 0 : index
    %c0_4 = arith.constant 0 : index
    %9 = vector.load %arg3[%c0_3, %c0_4] : memref<1x128xf32, #tpu.memory_space<vmem>>, vector<1x128xf32>
    %10 = vector.broadcast %9 : vector<1x128xf32> to vector<64x128xf32>
    %11 = arith.addf %8, %10 : vector<64x128xf32>
    %c0_5 = arith.constant 0 : index
    %c0_6 = arith.constant 0 : index
    %12 = vector.load %arg2[%c0_5, %c0_6] : memref<128x128xbf16, #tpu.memory_space<vmem>>, vector<128x128xbf16>
    %c0_7 = arith.constant 0 : index
    %c0_8 = arith.constant 0 : index
    %13 = vector.load %arg4[%c0_7, %c0_8] : memref<256x128xbf16, #tpu.memory_space<vmem>>, vector<256x128xbf16>
    %c0_9 = arith.constant 0 : index
    %c0_10 = arith.constant 0 : index
    %14 = vector.load %arg5[%c0_9, %c0_10] : memref<1x128xf32, #tpu.memory_space<vmem>>, vector<1x128xf32>
    %15 = vector.shape_cast %14 : vector<1x128xf32> to vector<1x128xf32>
    %16 = vector.broadcast %15 : vector<1x128xf32> to vector<8x128xf32>
    %17 = vector.extract_strided_slice %11 {offsets = [0, 0], sizes = [8, 128], strides = [1, 1]} : vector<64x128xf32> to vector<8x128xf32>
    %cst_11 = arith.constant 5.000000e-01 : f32
    %18 = vector.broadcast %cst_11 : f32 to vector<8x128xf32>
    %19 = arith.mulf %18, %17 : vector<8x128xf32>
    %20 = arith.select %5, %17, %19 : vector<8x128xi1>, vector<8x128xf32>
    %21 = math.tanh %20 : vector<8x128xf32>
    %cst_12 = arith.constant 5.000000e-01 : f32
    %22 = vector.broadcast %cst_12 : f32 to vector<8x128xf32>
    %23 = arith.mulf %22, %21 : vector<8x128xf32>
    %cst_13 = arith.constant 5.000000e-01 : f32
    %24 = vector.broadcast %cst_13 : f32 to vector<8x128xf32>
    %25 = arith.addf %23, %24 : vector<8x128xf32>
    %26 = arith.select %5, %21, %25 : vector<8x128xi1>, vector<8x128xf32>
    %c64_i32_14 = arith.constant 64 : i32
    %27 = tpu.dynamic_rotate %26 by %c64_i32_14 dim 1 : vector<8x128xf32>, i32 -> vector<8x128xf32>
    %28 = arith.mulf %26, %27 : vector<8x128xf32>
    %c32_i32 = arith.constant 32 : i32
    %29 = tpu.dynamic_rotate %26 by %c32_i32 dim 1 : vector<8x128xf32>, i32 -> vector<8x128xf32>
    %30 = math.tanh %28 : vector<8x128xf32>
    %31 = arith.mulf %29, %30 : vector<8x128xf32>
    %32 = arith.truncf %31 : vector<8x128xf32> to vector<8x128xbf16>
    %33 = vector.extract_strided_slice %13 {offsets = [0, 0], sizes = [128, 128], strides = [1, 1]} : vector<256x128xbf16> to vector<128x128xbf16>
    %cst_15 = arith.constant dense<0.000000e+00> : vector<8x128xf32>
    %34 = tpu.matmul %32, %33, %cst_15 {dimension_numbers = #tpu.dot_dimension_numbers<[1], [0], [0], [1], [0, 0, 1, 1], [], []>} : vector<8x128xbf16>, vector<128x128xbf16>, vector<8x128xf32> -> vector<8x128xf32>
    %35 = arith.addf %34, %16 : vector<8x128xf32>
    %cst_16 = arith.constant 5.000000e-01 : f32
    %36 = vector.broadcast %cst_16 : f32 to vector<8x128xf32>
    %37 = arith.mulf %36, %35 : vector<8x128xf32>
    %38 = arith.select %5, %35, %37 : vector<8x128xi1>, vector<8x128xf32>
    %39 = math.tanh %38 : vector<8x128xf32>
    %cst_17 = arith.constant 5.000000e-01 : f32
    %40 = vector.broadcast %cst_17 : f32 to vector<8x128xf32>
    %41 = arith.mulf %40, %39 : vector<8x128xf32>
    %cst_18 = arith.constant 5.000000e-01 : f32
    %42 = vector.broadcast %cst_18 : f32 to vector<8x128xf32>
    %43 = arith.addf %41, %42 : vector<8x128xf32>
    %44 = arith.select %5, %39, %43 : vector<8x128xi1>, vector<8x128xf32>
    %c64_i32_19 = arith.constant 64 : i32
    %45 = tpu.dynamic_rotate %44 by %c64_i32_19 dim 1 : vector<8x128xf32>, i32 -> vector<8x128xf32>
    %46 = arith.mulf %44, %45 : vector<8x128xf32>
    %c32_i32_20 = arith.constant 32 : i32
    %47 = tpu.dynamic_rotate %44 by %c32_i32_20 dim 1 : vector<8x128xf32>, i32 -> vector<8x128xf32>
    %48 = math.tanh %46 : vector<8x128xf32>
    %49 = arith.mulf %47, %48 : vector<8x128xf32>
    %50 = vector.extract_strided_slice %11 {offsets = [8, 0], sizes = [8, 128], strides = [1, 1]} : vector<64x128xf32> to vector<8x128xf32>
    %51 = arith.truncf %31 : vector<8x128xf32> to vector<8x128xbf16>
    %cst_21 = arith.constant dense<0.000000e+00> : vector<8x128xf32>
    %52 = tpu.matmul %51, %12, %cst_21 {dimension_numbers = #tpu.dot_dimension_numbers<[1], [0], [0], [1], [0, 0, 1, 1], [], []>} : vector<8x128xbf16>, vector<128x128xbf16>, vector<8x128xf32> -> vector<8x128xf32>
    %53 = arith.addf %50, %52 : vector<8x128xf32>
    %cst_22 = arith.constant 5.000000e-01 : f32
    %54 = vector.broadcast %cst_22 : f32 to vector<8x128xf32>
    %55 = arith.mulf %54, %53 : vector<8x128xf32>
    %56 = arith.select %5, %53, %55 : vector<8x128xi1>, vector<8x128xf32>
    %57 = math.tanh %56 : vector<8x128xf32>
    %cst_23 = arith.constant 5.000000e-01 : f32
    %58 = vector.broadcast %cst_23 : f32 to vector<8x128xf32>
    %59 = arith.mulf %58, %57 : vector<8x128xf32>
    %cst_24 = arith.constant 5.000000e-01 : f32
    %60 = vector.broadcast %cst_24 : f32 to vector<8x128xf32>
    %61 = arith.addf %59, %60 : vector<8x128xf32>
    %62 = arith.select %5, %57, %61 : vector<8x128xi1>, vector<8x128xf32>
    %c64_i32_25 = arith.constant 64 : i32
    %63 = tpu.dynamic_rotate %62 by %c64_i32_25 dim 1 : vector<8x128xf32>, i32 -> vector<8x128xf32>
    %64 = arith.mulf %62, %63 : vector<8x128xf32>
    %c96_i32_26 = arith.constant 96 : i32
    %65 = tpu.dynamic_rotate %62 by %c96_i32_26 dim 1 : vector<8x128xf32>, i32 -> vector<8x128xf32>
    %66 = arith.mulf %65, %28 : vector<8x128xf32>
    %67 = arith.addf %66, %64 : vector<8x128xf32>
    %c32_i32_27 = arith.constant 32 : i32
    %68 = tpu.dynamic_rotate %62 by %c32_i32_27 dim 1 : vector<8x128xf32>, i32 -> vector<8x128xf32>
    %69 = math.tanh %67 : vector<8x128xf32>
    %70 = arith.mulf %68, %69 : vector<8x128xf32>
    %71 = arith.truncf %70 : vector<8x128xf32> to vector<8x128xbf16>
    %72 = arith.truncf %49 : vector<8x128xf32> to vector<8x128xbf16>
    %73 = tpu.concatenate %71, %72 in 1 : vector<8x128xbf16>, vector<8x128xbf16> -> vector<8x256xbf16>
    %cst_28 = arith.constant dense<0.000000e+00> : vector<8x128xf32>
    %74 = tpu.matmul %73, %13, %cst_28 {dimension_numbers = #tpu.dot_dimension_numbers<[1], [0], [0], [1], [0, 0, 1, 1], [], []>} : vector<8x256xbf16>, vector<256x128xbf16>, vector<8x128xf32> -> vector<8x128xf32>
    %75 = arith.addf %74, %16 : vector<8x128xf32>
    %cst_29 = arith.constant 5.000000e-01 : f32
    %76 = vector.broadcast %cst_29 : f32 to vector<8x128xf32>
    %77 = arith.mulf %76, %75 : vector<8x128xf32>
    %78 = arith.select %5, %75, %77 : vector<8x128xi1>, vector<8x128xf32>
    %79 = math.tanh %78 : vector<8x128xf32>
    %cst_30 = arith.constant 5.000000e-01 : f32
    %80 = vector.broadcast %cst_30 : f32 to vector<8x128xf32>
    %81 = arith.mulf %80, %79 : vector<8x128xf32>
    %cst_31 = arith.constant 5.000000e-01 : f32
    %82 = vector.broadcast %cst_31 : f32 to vector<8x128xf32>
    %83 = arith.addf %81, %82 : vector<8x128xf32>
    %84 = arith.select %5, %79, %83 : vector<8x128xi1>, vector<8x128xf32>
    %c64_i32_32 = arith.constant 64 : i32
    %85 = tpu.dynamic_rotate %84 by %c64_i32_32 dim 1 : vector<8x128xf32>, i32 -> vector<8x128xf32>
    %86 = arith.mulf %84, %85 : vector<8x128xf32>
    %c96_i32_33 = arith.constant 96 : i32
    %87 = tpu.dynamic_rotate %84 by %c96_i32_33 dim 1 : vector<8x128xf32>, i32 -> vector<8x128xf32>
    %88 = arith.mulf %87, %46 : vector<8x128xf32>
    %89 = arith.addf %88, %86 : vector<8x128xf32>
    %c32_i32_34 = arith.constant 32 : i32
    %90 = tpu.dynamic_rotate %84 by %c32_i32_34 dim 1 : vector<8x128xf32>, i32 -> vector<8x128xf32>
    %91 = math.tanh %89 : vector<8x128xf32>
    %92 = arith.mulf %90, %91 : vector<8x128xf32>
    %93 = vector.extract_strided_slice %11 {offsets = [16, 0], sizes = [8, 128], strides = [1, 1]} : vector<64x128xf32> to vector<8x128xf32>
    %94 = arith.truncf %70 : vector<8x128xf32> to vector<8x128xbf16>
    %cst_35 = arith.constant dense<0.000000e+00> : vector<8x128xf32>
    %95 = tpu.matmul %94, %12, %cst_35 {dimension_numbers = #tpu.dot_dimension_numbers<[1], [0], [0], [1], [0, 0, 1, 1], [], []>} : vector<8x128xbf16>, vector<128x128xbf16>, vector<8x128xf32> -> vector<8x128xf32>
    %96 = arith.addf %93, %95 : vector<8x128xf32>
    %cst_36 = arith.constant 5.000000e-01 : f32
    %97 = vector.broadcast %cst_36 : f32 to vector<8x128xf32>
    %98 = arith.mulf %97, %96 : vector<8x128xf32>
    %99 = arith.select %5, %96, %98 : vector<8x128xi1>, vector<8x128xf32>
    %100 = math.tanh %99 : vector<8x128xf32>
    %cst_37 = arith.constant 5.000000e-01 : f32
    %101 = vector.broadcast %cst_37 : f32 to vector<8x128xf32>
    %102 = arith.mulf %101, %100 : vector<8x128xf32>
    %cst_38 = arith.constant 5.000000e-01 : f32
    %103 = vector.broadcast %cst_38 : f32 to vector<8x128xf32>
    %104 = arith.addf %102, %103 : vector<8x128xf32>
    %105 = arith.select %5, %100, %104 : vector<8x128xi1>, vector<8x128xf32>
    %c64_i32_39 = arith.constant 64 : i32
    %106 = tpu.dynamic_rotate %105 by %c64_i32_39 dim 1 : vector<8x128xf32>, i32 -> vector<8x128xf32>
    %107 = arith.mulf %105, %106 : vector<8x128xf32>
    %c96_i32_40 = arith.constant 96 : i32
    %108 = tpu.dynamic_rotate %105 by %c96_i32_40 dim 1 : vector<8x128xf32>, i32 -> vector<8x128xf32>
    %109 = arith.mulf %108, %67 : vector<8x128xf32>
    %110 = arith.addf %109, %107 : vector<8x128xf32>
    %c32_i32_41 = arith.constant 32 : i32
    %111 = tpu.dynamic_rotate %105 by %c32_i32_41 dim 1 : vector<8x128xf32>, i32 -> vector<8x128xf32>
    %112 = math.tanh %110 : vector<8x128xf32>
    %113 = arith.mulf %111, %112 : vector<8x128xf32>
    %114 = arith.truncf %113 : vector<8x128xf32> to vector<8x128xbf16>
    %115 = arith.truncf %92 : vector<8x128xf32> to vector<8x128xbf16>
    %116 = tpu.concatenate %114, %115 in 1 : vector<8x128xbf16>, vector<8x128xbf16> -> vector<8x256xbf16>
    %cst_42 = arith.constant dense<0.000000e+00> : vector<8x128xf32>
    %117 = tpu.matmul %116, %13, %cst_42 {dimension_numbers = #tpu.dot_dimension_numbers<[1], [0], [0], [1], [0, 0, 1, 1], [], []>} : vector<8x256xbf16>, vector<256x128xbf16>, vector<8x128xf32> -> vector<8x128xf32>
    %118 = arith.addf %117, %16 : vector<8x128xf32>
    %cst_43 = arith.constant 5.000000e-01 : f32
    %119 = vector.broadcast %cst_43 : f32 to vector<8x128xf32>
    %120 = arith.mulf %119, %118 : vector<8x128xf32>
    %121 = arith.select %5, %118, %120 : vector<8x128xi1>, vector<8x128xf32>
    %122 = math.tanh %121 : vector<8x128xf32>
    %cst_44 = arith.constant 5.000000e-01 : f32
    %123 = vector.broadcast %cst_44 : f32 to vector<8x128xf32>
    %124 = arith.mulf %123, %122 : vector<8x128xf32>
    %cst_45 = arith.constant 5.000000e-01 : f32
    %125 = vector.broadcast %cst_45 : f32 to vector<8x128xf32>
    %126 = arith.addf %124, %125 : vector<8x128xf32>
    %127 = arith.select %5, %122, %126 : vector<8x128xi1>, vector<8x128xf32>
    %c64_i32_46 = arith.constant 64 : i32
    %128 = tpu.dynamic_rotate %127 by %c64_i32_46 dim 1 : vector<8x128xf32>, i32 -> vector<8x128xf32>
    %129 = arith.mulf %127, %128 : vector<8x128xf32>
    %c96_i32_47 = arith.constant 96 : i32
    %130 = tpu.dynamic_rotate %127 by %c96_i32_47 dim 1 : vector<8x128xf32>, i32 -> vector<8x128xf32>
    %131 = arith.mulf %130, %89 : vector<8x128xf32>
    %132 = arith.addf %131, %129 : vector<8x128xf32>
    %c32_i32_48 = arith.constant 32 : i32
    %133 = tpu.dynamic_rotate %127 by %c32_i32_48 dim 1 : vector<8x128xf32>, i32 -> vector<8x128xf32>
    %134 = math.tanh %132 : vector<8x128xf32>
    %135 = arith.mulf %133, %134 : vector<8x128xf32>
    %136 = vector.extract_strided_slice %11 {offsets = [24, 0], sizes = [8, 128], strides = [1, 1]} : vector<64x128xf32> to vector<8x128xf32>
    %137 = arith.truncf %113 : vector<8x128xf32> to vector<8x128xbf16>
    %cst_49 = arith.constant dense<0.000000e+00> : vector<8x128xf32>
    %138 = tpu.matmul %137, %12, %cst_49 {dimension_numbers = #tpu.dot_dimension_numbers<[1], [0], [0], [1], [0, 0, 1, 1], [], []>} : vector<8x128xbf16>, vector<128x128xbf16>, vector<8x128xf32> -> vector<8x128xf32>
    %139 = arith.addf %136, %138 : vector<8x128xf32>
    %cst_50 = arith.constant 5.000000e-01 : f32
    %140 = vector.broadcast %cst_50 : f32 to vector<8x128xf32>
    %141 = arith.mulf %140, %139 : vector<8x128xf32>
    %142 = arith.select %5, %139, %141 : vector<8x128xi1>, vector<8x128xf32>
    %143 = math.tanh %142 : vector<8x128xf32>
    %cst_51 = arith.constant 5.000000e-01 : f32
    %144 = vector.broadcast %cst_51 : f32 to vector<8x128xf32>
    %145 = arith.mulf %144, %143 : vector<8x128xf32>
    %cst_52 = arith.constant 5.000000e-01 : f32
    %146 = vector.broadcast %cst_52 : f32 to vector<8x128xf32>
    %147 = arith.addf %145, %146 : vector<8x128xf32>
    %148 = arith.select %5, %143, %147 : vector<8x128xi1>, vector<8x128xf32>
    %c64_i32_53 = arith.constant 64 : i32
    %149 = tpu.dynamic_rotate %148 by %c64_i32_53 dim 1 : vector<8x128xf32>, i32 -> vector<8x128xf32>
    %150 = arith.mulf %148, %149 : vector<8x128xf32>
    %c96_i32_54 = arith.constant 96 : i32
    %151 = tpu.dynamic_rotate %148 by %c96_i32_54 dim 1 : vector<8x128xf32>, i32 -> vector<8x128xf32>
    %152 = arith.mulf %151, %110 : vector<8x128xf32>
    %153 = arith.addf %152, %150 : vector<8x128xf32>
    %c32_i32_55 = arith.constant 32 : i32
    %154 = tpu.dynamic_rotate %148 by %c32_i32_55 dim 1 : vector<8x128xf32>, i32 -> vector<8x128xf32>
    %155 = math.tanh %153 : vector<8x128xf32>
    %156 = arith.mulf %154, %155 : vector<8x128xf32>
    %157 = arith.truncf %156 : vector<8x128xf32> to vector<8x128xbf16>
    %158 = arith.truncf %135 : vector<8x128xf32> to vector<8x128xbf16>
    %159 = tpu.concatenate %157, %158 in 1 : vector<8x128xbf16>, vector<8x128xbf16> -> vector<8x256xbf16>
    %cst_56 = arith.constant dense<0.000000e+00> : vector<8x128xf32>
    %160 = tpu.matmul %159, %13, %cst_56 {dimension_numbers = #tpu.dot_dimension_numbers<[1], [0], [0], [1], [0, 0, 1, 1], [], []>} : vector<8x256xbf16>, vector<256x128xbf16>, vector<8x128xf32> -> vector<8x128xf32>
    %161 = arith.addf %160, %16 : vector<8x128xf32>
    %cst_57 = arith.constant 5.000000e-01 : f32
    %162 = vector.broadcast %cst_57 : f32 to vector<8x128xf32>
    %163 = arith.mulf %162, %161 : vector<8x128xf32>
    %164 = arith.select %5, %161, %163 : vector<8x128xi1>, vector<8x128xf32>
    %165 = math.tanh %164 : vector<8x128xf32>
    %cst_58 = arith.constant 5.000000e-01 : f32
    %166 = vector.broadcast %cst_58 : f32 to vector<8x128xf32>
    %167 = arith.mulf %166, %165 : vector<8x128xf32>
    %cst_59 = arith.constant 5.000000e-01 : f32
    %168 = vector.broadcast %cst_59 : f32 to vector<8x128xf32>
    %169 = arith.addf %167, %168 : vector<8x128xf32>
    %170 = arith.select %5, %165, %169 : vector<8x128xi1>, vector<8x128xf32>
    %c64_i32_60 = arith.constant 64 : i32
    %171 = tpu.dynamic_rotate %170 by %c64_i32_60 dim 1 : vector<8x128xf32>, i32 -> vector<8x128xf32>
    %172 = arith.mulf %170, %171 : vector<8x128xf32>
    %c96_i32_61 = arith.constant 96 : i32
    %173 = tpu.dynamic_rotate %170 by %c96_i32_61 dim 1 : vector<8x128xf32>, i32 -> vector<8x128xf32>
    %174 = arith.mulf %173, %132 : vector<8x128xf32>
    %175 = arith.addf %174, %172 : vector<8x128xf32>
    %c32_i32_62 = arith.constant 32 : i32
    %176 = tpu.dynamic_rotate %170 by %c32_i32_62 dim 1 : vector<8x128xf32>, i32 -> vector<8x128xf32>
    %177 = math.tanh %175 : vector<8x128xf32>
    %178 = arith.mulf %176, %177 : vector<8x128xf32>
    %179 = vector.extract_strided_slice %11 {offsets = [32, 0], sizes = [8, 128], strides = [1, 1]} : vector<64x128xf32> to vector<8x128xf32>
    %180 = arith.truncf %156 : vector<8x128xf32> to vector<8x128xbf16>
    %cst_63 = arith.constant dense<0.000000e+00> : vector<8x128xf32>
    %181 = tpu.matmul %180, %12, %cst_63 {dimension_numbers = #tpu.dot_dimension_numbers<[1], [0], [0], [1], [0, 0, 1, 1], [], []>} : vector<8x128xbf16>, vector<128x128xbf16>, vector<8x128xf32> -> vector<8x128xf32>
    %182 = arith.addf %179, %181 : vector<8x128xf32>
    %cst_64 = arith.constant 5.000000e-01 : f32
    %183 = vector.broadcast %cst_64 : f32 to vector<8x128xf32>
    %184 = arith.mulf %183, %182 : vector<8x128xf32>
    %185 = arith.select %5, %182, %184 : vector<8x128xi1>, vector<8x128xf32>
    %186 = math.tanh %185 : vector<8x128xf32>
    %cst_65 = arith.constant 5.000000e-01 : f32
    %187 = vector.broadcast %cst_65 : f32 to vector<8x128xf32>
    %188 = arith.mulf %187, %186 : vector<8x128xf32>
    %cst_66 = arith.constant 5.000000e-01 : f32
    %189 = vector.broadcast %cst_66 : f32 to vector<8x128xf32>
    %190 = arith.addf %188, %189 : vector<8x128xf32>
    %191 = arith.select %5, %186, %190 : vector<8x128xi1>, vector<8x128xf32>
    %c64_i32_67 = arith.constant 64 : i32
    %192 = tpu.dynamic_rotate %191 by %c64_i32_67 dim 1 : vector<8x128xf32>, i32 -> vector<8x128xf32>
    %193 = arith.mulf %191, %192 : vector<8x128xf32>
    %c96_i32_68 = arith.constant 96 : i32
    %194 = tpu.dynamic_rotate %191 by %c96_i32_68 dim 1 : vector<8x128xf32>, i32 -> vector<8x128xf32>
    %195 = arith.mulf %194, %153 : vector<8x128xf32>
    %196 = arith.addf %195, %193 : vector<8x128xf32>
    %c32_i32_69 = arith.constant 32 : i32
    %197 = tpu.dynamic_rotate %191 by %c32_i32_69 dim 1 : vector<8x128xf32>, i32 -> vector<8x128xf32>
    %198 = math.tanh %196 : vector<8x128xf32>
    %199 = arith.mulf %197, %198 : vector<8x128xf32>
    %200 = arith.truncf %199 : vector<8x128xf32> to vector<8x128xbf16>
    %201 = arith.truncf %178 : vector<8x128xf32> to vector<8x128xbf16>
    %202 = tpu.concatenate %200, %201 in 1 : vector<8x128xbf16>, vector<8x128xbf16> -> vector<8x256xbf16>
    %cst_70 = arith.constant dense<0.000000e+00> : vector<8x128xf32>
    %203 = tpu.matmul %202, %13, %cst_70 {dimension_numbers = #tpu.dot_dimension_numbers<[1], [0], [0], [1], [0, 0, 1, 1], [], []>} : vector<8x256xbf16>, vector<256x128xbf16>, vector<8x128xf32> -> vector<8x128xf32>
    %204 = arith.addf %203, %16 : vector<8x128xf32>
    %cst_71 = arith.constant 5.000000e-01 : f32
    %205 = vector.broadcast %cst_71 : f32 to vector<8x128xf32>
    %206 = arith.mulf %205, %204 : vector<8x128xf32>
    %207 = arith.select %5, %204, %206 : vector<8x128xi1>, vector<8x128xf32>
    %208 = math.tanh %207 : vector<8x128xf32>
    %cst_72 = arith.constant 5.000000e-01 : f32
    %209 = vector.broadcast %cst_72 : f32 to vector<8x128xf32>
    %210 = arith.mulf %209, %208 : vector<8x128xf32>
    %cst_73 = arith.constant 5.000000e-01 : f32
    %211 = vector.broadcast %cst_73 : f32 to vector<8x128xf32>
    %212 = arith.addf %210, %211 : vector<8x128xf32>
    %213 = arith.select %5, %208, %212 : vector<8x128xi1>, vector<8x128xf32>
    %c64_i32_74 = arith.constant 64 : i32
    %214 = tpu.dynamic_rotate %213 by %c64_i32_74 dim 1 : vector<8x128xf32>, i32 -> vector<8x128xf32>
    %215 = arith.mulf %213, %214 : vector<8x128xf32>
    %c96_i32_75 = arith.constant 96 : i32
    %216 = tpu.dynamic_rotate %213 by %c96_i32_75 dim 1 : vector<8x128xf32>, i32 -> vector<8x128xf32>
    %217 = arith.mulf %216, %175 : vector<8x128xf32>
    %218 = arith.addf %217, %215 : vector<8x128xf32>
    %c32_i32_76 = arith.constant 32 : i32
    %219 = tpu.dynamic_rotate %213 by %c32_i32_76 dim 1 : vector<8x128xf32>, i32 -> vector<8x128xf32>
    %220 = math.tanh %218 : vector<8x128xf32>
    %221 = arith.mulf %219, %220 : vector<8x128xf32>
    %222 = vector.extract_strided_slice %11 {offsets = [40, 0], sizes = [8, 128], strides = [1, 1]} : vector<64x128xf32> to vector<8x128xf32>
    %223 = arith.truncf %199 : vector<8x128xf32> to vector<8x128xbf16>
    %cst_77 = arith.constant dense<0.000000e+00> : vector<8x128xf32>
    %224 = tpu.matmul %223, %12, %cst_77 {dimension_numbers = #tpu.dot_dimension_numbers<[1], [0], [0], [1], [0, 0, 1, 1], [], []>} : vector<8x128xbf16>, vector<128x128xbf16>, vector<8x128xf32> -> vector<8x128xf32>
    %225 = arith.addf %222, %224 : vector<8x128xf32>
    %cst_78 = arith.constant 5.000000e-01 : f32
    %226 = vector.broadcast %cst_78 : f32 to vector<8x128xf32>
    %227 = arith.mulf %226, %225 : vector<8x128xf32>
    %228 = arith.select %5, %225, %227 : vector<8x128xi1>, vector<8x128xf32>
    %229 = math.tanh %228 : vector<8x128xf32>
    %cst_79 = arith.constant 5.000000e-01 : f32
    %230 = vector.broadcast %cst_79 : f32 to vector<8x128xf32>
    %231 = arith.mulf %230, %229 : vector<8x128xf32>
    %cst_80 = arith.constant 5.000000e-01 : f32
    %232 = vector.broadcast %cst_80 : f32 to vector<8x128xf32>
    %233 = arith.addf %231, %232 : vector<8x128xf32>
    %234 = arith.select %5, %229, %233 : vector<8x128xi1>, vector<8x128xf32>
    %c64_i32_81 = arith.constant 64 : i32
    %235 = tpu.dynamic_rotate %234 by %c64_i32_81 dim 1 : vector<8x128xf32>, i32 -> vector<8x128xf32>
    %236 = arith.mulf %234, %235 : vector<8x128xf32>
    %c96_i32_82 = arith.constant 96 : i32
    %237 = tpu.dynamic_rotate %234 by %c96_i32_82 dim 1 : vector<8x128xf32>, i32 -> vector<8x128xf32>
    %238 = arith.mulf %237, %196 : vector<8x128xf32>
    %239 = arith.addf %238, %236 : vector<8x128xf32>
    %c32_i32_83 = arith.constant 32 : i32
    %240 = tpu.dynamic_rotate %234 by %c32_i32_83 dim 1 : vector<8x128xf32>, i32 -> vector<8x128xf32>
    %241 = math.tanh %239 : vector<8x128xf32>
    %242 = arith.mulf %240, %241 : vector<8x128xf32>
    %243 = arith.truncf %242 : vector<8x128xf32> to vector<8x128xbf16>
    %244 = arith.truncf %221 : vector<8x128xf32> to vector<8x128xbf16>
    %245 = tpu.concatenate %243, %244 in 1 : vector<8x128xbf16>, vector<8x128xbf16> -> vector<8x256xbf16>
    %cst_84 = arith.constant dense<0.000000e+00> : vector<8x128xf32>
    %246 = tpu.matmul %245, %13, %cst_84 {dimension_numbers = #tpu.dot_dimension_numbers<[1], [0], [0], [1], [0, 0, 1, 1], [], []>} : vector<8x256xbf16>, vector<256x128xbf16>, vector<8x128xf32> -> vector<8x128xf32>
    %247 = arith.addf %246, %16 : vector<8x128xf32>
    %cst_85 = arith.constant 5.000000e-01 : f32
    %248 = vector.broadcast %cst_85 : f32 to vector<8x128xf32>
    %249 = arith.mulf %248, %247 : vector<8x128xf32>
    %250 = arith.select %5, %247, %249 : vector<8x128xi1>, vector<8x128xf32>
    %251 = math.tanh %250 : vector<8x128xf32>
    %cst_86 = arith.constant 5.000000e-01 : f32
    %252 = vector.broadcast %cst_86 : f32 to vector<8x128xf32>
    %253 = arith.mulf %252, %251 : vector<8x128xf32>
    %cst_87 = arith.constant 5.000000e-01 : f32
    %254 = vector.broadcast %cst_87 : f32 to vector<8x128xf32>
    %255 = arith.addf %253, %254 : vector<8x128xf32>
    %256 = arith.select %5, %251, %255 : vector<8x128xi1>, vector<8x128xf32>
    %c64_i32_88 = arith.constant 64 : i32
    %257 = tpu.dynamic_rotate %256 by %c64_i32_88 dim 1 : vector<8x128xf32>, i32 -> vector<8x128xf32>
    %258 = arith.mulf %256, %257 : vector<8x128xf32>
    %c96_i32_89 = arith.constant 96 : i32
    %259 = tpu.dynamic_rotate %256 by %c96_i32_89 dim 1 : vector<8x128xf32>, i32 -> vector<8x128xf32>
    %260 = arith.mulf %259, %218 : vector<8x128xf32>
    %261 = arith.addf %260, %258 : vector<8x128xf32>
    %c32_i32_90 = arith.constant 32 : i32
    %262 = tpu.dynamic_rotate %256 by %c32_i32_90 dim 1 : vector<8x128xf32>, i32 -> vector<8x128xf32>
    %263 = math.tanh %261 : vector<8x128xf32>
    %264 = arith.mulf %262, %263 : vector<8x128xf32>
    %265 = vector.extract_strided_slice %11 {offsets = [48, 0], sizes = [8, 128], strides = [1, 1]} : vector<64x128xf32> to vector<8x128xf32>
    %266 = arith.truncf %242 : vector<8x128xf32> to vector<8x128xbf16>
    %cst_91 = arith.constant dense<0.000000e+00> : vector<8x128xf32>
    %267 = tpu.matmul %266, %12, %cst_91 {dimension_numbers = #tpu.dot_dimension_numbers<[1], [0], [0], [1], [0, 0, 1, 1], [], []>} : vector<8x128xbf16>, vector<128x128xbf16>, vector<8x128xf32> -> vector<8x128xf32>
    %268 = arith.addf %265, %267 : vector<8x128xf32>
    %cst_92 = arith.constant 5.000000e-01 : f32
    %269 = vector.broadcast %cst_92 : f32 to vector<8x128xf32>
    %270 = arith.mulf %269, %268 : vector<8x128xf32>
    %271 = arith.select %5, %268, %270 : vector<8x128xi1>, vector<8x128xf32>
    %272 = math.tanh %271 : vector<8x128xf32>
    %cst_93 = arith.constant 5.000000e-01 : f32
    %273 = vector.broadcast %cst_93 : f32 to vector<8x128xf32>
    %274 = arith.mulf %273, %272 : vector<8x128xf32>
    %cst_94 = arith.constant 5.000000e-01 : f32
    %275 = vector.broadcast %cst_94 : f32 to vector<8x128xf32>
    %276 = arith.addf %274, %275 : vector<8x128xf32>
    %277 = arith.select %5, %272, %276 : vector<8x128xi1>, vector<8x128xf32>
    %c64_i32_95 = arith.constant 64 : i32
    %278 = tpu.dynamic_rotate %277 by %c64_i32_95 dim 1 : vector<8x128xf32>, i32 -> vector<8x128xf32>
    %279 = arith.mulf %277, %278 : vector<8x128xf32>
    %c96_i32_96 = arith.constant 96 : i32
    %280 = tpu.dynamic_rotate %277 by %c96_i32_96 dim 1 : vector<8x128xf32>, i32 -> vector<8x128xf32>
    %281 = arith.mulf %280, %239 : vector<8x128xf32>
    %282 = arith.addf %281, %279 : vector<8x128xf32>
    %c32_i32_97 = arith.constant 32 : i32
    %283 = tpu.dynamic_rotate %277 by %c32_i32_97 dim 1 : vector<8x128xf32>, i32 -> vector<8x128xf32>
    %284 = math.tanh %282 : vector<8x128xf32>
    %285 = arith.mulf %283, %284 : vector<8x128xf32>
    %286 = arith.truncf %285 : vector<8x128xf32> to vector<8x128xbf16>
    %287 = arith.truncf %264 : vector<8x128xf32> to vector<8x128xbf16>
    %288 = tpu.concatenate %286, %287 in 1 : vector<8x128xbf16>, vector<8x128xbf16> -> vector<8x256xbf16>
    %cst_98 = arith.constant dense<0.000000e+00> : vector<8x128xf32>
    %289 = tpu.matmul %288, %13, %cst_98 {dimension_numbers = #tpu.dot_dimension_numbers<[1], [0], [0], [1], [0, 0, 1, 1], [], []>} : vector<8x256xbf16>, vector<256x128xbf16>, vector<8x128xf32> -> vector<8x128xf32>
    %290 = arith.addf %289, %16 : vector<8x128xf32>
    %cst_99 = arith.constant 5.000000e-01 : f32
    %291 = vector.broadcast %cst_99 : f32 to vector<8x128xf32>
    %292 = arith.mulf %291, %290 : vector<8x128xf32>
    %293 = arith.select %5, %290, %292 : vector<8x128xi1>, vector<8x128xf32>
    %294 = math.tanh %293 : vector<8x128xf32>
    %cst_100 = arith.constant 5.000000e-01 : f32
    %295 = vector.broadcast %cst_100 : f32 to vector<8x128xf32>
    %296 = arith.mulf %295, %294 : vector<8x128xf32>
    %cst_101 = arith.constant 5.000000e-01 : f32
    %297 = vector.broadcast %cst_101 : f32 to vector<8x128xf32>
    %298 = arith.addf %296, %297 : vector<8x128xf32>
    %299 = arith.select %5, %294, %298 : vector<8x128xi1>, vector<8x128xf32>
    %c64_i32_102 = arith.constant 64 : i32
    %300 = tpu.dynamic_rotate %299 by %c64_i32_102 dim 1 : vector<8x128xf32>, i32 -> vector<8x128xf32>
    %301 = arith.mulf %299, %300 : vector<8x128xf32>
    %c96_i32_103 = arith.constant 96 : i32
    %302 = tpu.dynamic_rotate %299 by %c96_i32_103 dim 1 : vector<8x128xf32>, i32 -> vector<8x128xf32>
    %303 = arith.mulf %302, %261 : vector<8x128xf32>
    %304 = arith.addf %303, %301 : vector<8x128xf32>
    %c32_i32_104 = arith.constant 32 : i32
    %305 = tpu.dynamic_rotate %299 by %c32_i32_104 dim 1 : vector<8x128xf32>, i32 -> vector<8x128xf32>
    %306 = math.tanh %304 : vector<8x128xf32>
    %307 = arith.mulf %305, %306 : vector<8x128xf32>
    %308 = vector.extract_strided_slice %11 {offsets = [56, 0], sizes = [8, 128], strides = [1, 1]} : vector<64x128xf32> to vector<8x128xf32>
    %309 = arith.truncf %285 : vector<8x128xf32> to vector<8x128xbf16>
    %cst_105 = arith.constant dense<0.000000e+00> : vector<8x128xf32>
    %310 = tpu.matmul %309, %12, %cst_105 {dimension_numbers = #tpu.dot_dimension_numbers<[1], [0], [0], [1], [0, 0, 1, 1], [], []>} : vector<8x128xbf16>, vector<128x128xbf16>, vector<8x128xf32> -> vector<8x128xf32>
    %311 = arith.addf %308, %310 : vector<8x128xf32>
    %cst_106 = arith.constant 5.000000e-01 : f32
    %312 = vector.broadcast %cst_106 : f32 to vector<8x128xf32>
    %313 = arith.mulf %312, %311 : vector<8x128xf32>
    %314 = arith.select %5, %311, %313 : vector<8x128xi1>, vector<8x128xf32>
    %315 = math.tanh %314 : vector<8x128xf32>
    %cst_107 = arith.constant 5.000000e-01 : f32
    %316 = vector.broadcast %cst_107 : f32 to vector<8x128xf32>
    %317 = arith.mulf %316, %315 : vector<8x128xf32>
    %cst_108 = arith.constant 5.000000e-01 : f32
    %318 = vector.broadcast %cst_108 : f32 to vector<8x128xf32>
    %319 = arith.addf %317, %318 : vector<8x128xf32>
    %320 = arith.select %5, %315, %319 : vector<8x128xi1>, vector<8x128xf32>
    %c64_i32_109 = arith.constant 64 : i32
    %321 = tpu.dynamic_rotate %320 by %c64_i32_109 dim 1 : vector<8x128xf32>, i32 -> vector<8x128xf32>
    %322 = arith.mulf %320, %321 : vector<8x128xf32>
    %c96_i32_110 = arith.constant 96 : i32
    %323 = tpu.dynamic_rotate %320 by %c96_i32_110 dim 1 : vector<8x128xf32>, i32 -> vector<8x128xf32>
    %324 = arith.mulf %323, %282 : vector<8x128xf32>
    %325 = arith.addf %324, %322 : vector<8x128xf32>
    %c32_i32_111 = arith.constant 32 : i32
    %326 = tpu.dynamic_rotate %320 by %c32_i32_111 dim 1 : vector<8x128xf32>, i32 -> vector<8x128xf32>
    %327 = math.tanh %325 : vector<8x128xf32>
    %328 = arith.mulf %326, %327 : vector<8x128xf32>
    %329 = arith.truncf %328 : vector<8x128xf32> to vector<8x128xbf16>
    %330 = arith.truncf %307 : vector<8x128xf32> to vector<8x128xbf16>
    %331 = tpu.concatenate %329, %330 in 1 : vector<8x128xbf16>, vector<8x128xbf16> -> vector<8x256xbf16>
    %cst_112 = arith.constant dense<0.000000e+00> : vector<8x128xf32>
    %332 = tpu.matmul %331, %13, %cst_112 {dimension_numbers = #tpu.dot_dimension_numbers<[1], [0], [0], [1], [0, 0, 1, 1], [], []>} : vector<8x256xbf16>, vector<256x128xbf16>, vector<8x128xf32> -> vector<8x128xf32>
    %333 = arith.addf %332, %16 : vector<8x128xf32>
    %cst_113 = arith.constant 5.000000e-01 : f32
    %334 = vector.broadcast %cst_113 : f32 to vector<8x128xf32>
    %335 = arith.mulf %334, %333 : vector<8x128xf32>
    %336 = arith.select %5, %333, %335 : vector<8x128xi1>, vector<8x128xf32>
    %337 = math.tanh %336 : vector<8x128xf32>
    %cst_114 = arith.constant 5.000000e-01 : f32
    %338 = vector.broadcast %cst_114 : f32 to vector<8x128xf32>
    %339 = arith.mulf %338, %337 : vector<8x128xf32>
    %cst_115 = arith.constant 5.000000e-01 : f32
    %340 = vector.broadcast %cst_115 : f32 to vector<8x128xf32>
    %341 = arith.addf %339, %340 : vector<8x128xf32>
    %342 = arith.select %5, %337, %341 : vector<8x128xi1>, vector<8x128xf32>
    %c64_i32_116 = arith.constant 64 : i32
    %343 = tpu.dynamic_rotate %342 by %c64_i32_116 dim 1 : vector<8x128xf32>, i32 -> vector<8x128xf32>
    %344 = arith.mulf %342, %343 : vector<8x128xf32>
    %c96_i32_117 = arith.constant 96 : i32
    %345 = tpu.dynamic_rotate %342 by %c96_i32_117 dim 1 : vector<8x128xf32>, i32 -> vector<8x128xf32>
    %346 = arith.mulf %345, %304 : vector<8x128xf32>
    %347 = arith.addf %346, %344 : vector<8x128xf32>
    %c32_i32_118 = arith.constant 32 : i32
    %348 = tpu.dynamic_rotate %342 by %c32_i32_118 dim 1 : vector<8x128xf32>, i32 -> vector<8x128xf32>
    %349 = math.tanh %347 : vector<8x128xf32>
    %350 = arith.mulf %348, %349 : vector<8x128xf32>
    %351 = arith.truncf %350 : vector<8x128xf32> to vector<8x128xbf16>
    %c0_119 = arith.constant 0 : index
    %c0_120 = arith.constant 0 : index
    %352 = vector.load %arg6[%c0_119, %c0_120] : memref<128x128xbf16, #tpu.memory_space<vmem>>, vector<128x128xbf16>
    %cst_121 = arith.constant dense<0.000000e+00> : vector<8x128xf32>
    %353 = tpu.matmul %351, %352, %cst_121 {dimension_numbers = #tpu.dot_dimension_numbers<[1], [0], [0], [1], [0, 0, 1, 1], [], []>} : vector<8x128xbf16>, vector<128x128xbf16>, vector<8x128xf32> -> vector<8x128xf32>
    %c0_122 = arith.constant 0 : index
    %c0_123 = arith.constant 0 : index
    %354 = vector.load %arg7[%c0_122, %c0_123] : memref<1x128xf32, #tpu.memory_space<vmem>>, vector<1x128xf32>
    %355 = vector.broadcast %354 : vector<1x128xf32> to vector<8x128xf32>
    %356 = arith.addf %353, %355 : vector<8x128xf32>
    %c0_124 = arith.constant 0 : index
    %c0_125 = arith.constant 0 : index
    %357 = vector.load %arg8[%c0_124, %c0_125] : memref<8x128xf32, #tpu.memory_space<vmem>>, vector<8x128xf32>
    tpu.vector_store %arg8[%c0_124, %c0_125], %356 {strides = array<i32>} : memref<8x128xf32, #tpu.memory_space<vmem>>, vector<8x128xf32>,
    return
  }
}

</mosaic_0001>

<bundles_post_ra>
// kernel: lstm_model_forward.1
= control target key start
LH: loop header
LB: loop body
LE: loop exit
PB: predicated region body
PF: predicated region fallthrough
CT: control target
= control target key end

     0   :  { %13 = vsyncpa [#allocation3], 0  ;;  %s2710_s0 = inlined_call_operand.vmem [shape: bf16[64,8], index: 0, kind: input, shape index: {}]   ;;  %s2711_s1 = inlined_call_operand.vmem [shape: bf16[8,128], index: 1, kind: input, shape index: {}]   ;;  %s2712_s2 = inlined_call_operand.vmem [shape: bf16[128,128], index: 2, kind: input, shape index: {}]   ;;  %s2713_s3 = inlined_call_operand.vmem [shape: f32[1,128], index: 3, kind: input, shape index: {}]   ;;  %s2714_s4 = inlined_call_operand.hbm [shape: bf16[256,128], index: 4, kind: input, shape index: {}]   ;;  %s2715_s5 = inlined_call_operand.vmem [shape: f32[1,128], index: 5, kind: input, shape index: {}]   ;;  %s2716_s6 = inlined_call_operand.hbm [shape: bf16[128,128], index: 6, kind: input, shape index: {}]   ;;  %s2717_s7 = inlined_call_operand.vmem [shape: f32[1,128], index: 7, kind: input, shape index: {}]   ;;  %s2718_s8 = inlined_call_operand.vmem [shape: f32[8,128], index: 8, kind: output, shape index: {}]  }
   0x1   :  { %14 = vsyncpa [#allocation5], 0  ;;  %s2031_s27 = smov [#allocation2]   ;;  %s1983_s9 = scalar_lea.hbm %s2714_s4, 2048 }
   0x2   :  { %s28_s28 = sshll.u32 %s2031_s27, 4  ;;  %p1984_p0 = scmp.ne.s32.totalorder %s2714_s4, %s1983_s9  ;;  %s29_s28 = int_to_ptr.vmem [resolvable:$true] %s28_s28 }
   0x3   :  { %p1987_p1 = scmp.lt.u32.totalorder %s1983_s9, %s2714_s4 }
   0x5   :  { %p1989_p2 = pnand %p1987_p1, %p1984_p0 }
   0x7   :  { %1992 = shalt.err (!%p1989_p2)
}
   0x8   :  { %s1993_s14 = scalar_lea.vmem %s29_s28, 2048  ;;  %p1998_p4 = scmp.lt.s32.totalorder %s29_s28, %s29_s28 }
   0x9   :  { %p1994_p3 = scmp.ne.s32.totalorder %s29_s28, %s1993_s14  ;;  %p1999_p5 = scmp.lt.s32.totalorder %s1993_s14, %s1993_s14 }
   0xb   :  { %p2000_p6 = por %p1999_p5, %p1998_p4 }
   0xd   :  { %p2001_p7 = pnand %p2000_p6, %p1994_p3 }
   0xf   :  { %2004 = shalt.err (!%p2001_p7)
}
  0x10   :  { %s2032_s15 = smov 64   ;;  %s2033_s16 = smov 4  }
  0x11   :  { %34 = dma.hbm_to_vmem [thread:$0]  %s2714_s4, 2048, %s29_s28, [#allocation3], %s2032_s15, %s2032_s15, %s2033_s16  }
  0x12   :  { %s2034_s19 = smov [#allocation4]   ;;  %s2005_s23 = scalar_lea.hbm %s2716_s6, 1024 }
  0x13   :  { %s42_s20 = sshll.u32 %s2034_s19, 4  ;;  %p2006_p8 = scmp.ne.s32.totalorder %s2716_s6, %s2005_s23  ;;  %s43_s20 = int_to_ptr.vmem [resolvable:$true] %s42_s20 }
  0x14   :  { %p2009_p9 = scmp.lt.u32.totalorder %s2005_s23, %s2716_s6 }
  0x16   :  { %p2011_p10 = pnand %p2009_p9, %p2006_p8 }
  0x18   :  { %2014 = shalt.err (!%p2011_p10)
}
  0x19   :  { %s2015_s29 = scalar_lea.vmem %s43_s20, 1024  ;;  %p2020_p12 = scmp.lt.s32.totalorder %s43_s20, %s43_s20 }
  0x1a   :  { %p2016_p11 = scmp.ne.s32.totalorder %s43_s20, %s2015_s29  ;;  %p2021_p13 = scmp.lt.s32.totalorder %s2015_s29, %s2015_s29 }
  0x1c   :  { %p2022_p0 = por %p2021_p13, %p2020_p12 }
  0x1e   :  { %p2023_p1 = pnand %p2022_p0, %p2016_p11 }
  0x20   :  { %2026 = shalt.err (!%p2023_p1)
}
  0x21   :  { %48 = dma.hbm_to_vmem [thread:$0]  %s2716_s6, 1024, %s43_s20, [#allocation5], %s2032_s15, %s2032_s15, %s2033_s16  }
  0x22   :  { %2027 = dma.done.wait [#allocation3], 2048  }
  0x23   :  { %2028 = vsyncadd [#allocation3], 4294965248 }
  0x24   :  { %2029 = dma.done.wait [#allocation5], 1024  }
  0x25   :  { %2030 = vsyncadd [#allocation5], 4294966272  ;;  %vm112_vm0 = vcmask 1043456   ;;  %vm99_vm1 = vcmask 64512   ;;  %v71_v0 = vld [vmem:[%s2711_s1] sm:$0xf]  ;;  %v58_v13 = vlaneseq }
  0x26   :  { %1858 = vmatprep.subr.msk.bf16.mxu0 %vm112_vm0, %v71_v0  ;;  %v114_v1 = vsel %vm112_vm0, %v71_v0, 0  ;;  %v1867_v2 = vld [vmem:[%s2710_s0] sm:$0xff]   ;;  %v1868_v3 = vld [vmem:[%s2710_s0 + $0x8] sm:$0xff]   ;;  %v2035_v6 = vmov 0.0   ;;  %v2145_v9 = vld [vmem:[#allocation2 + $0x10] sm:$0xff]   ;;  %vm2036_vm5 = vmmov 0  }
  0x27   :  { %1669 = vmatpush3.bf16.msra.mxu0 %v114_v1  ;;  %1670 = vmatprep.mubr.msk.bf16.mxu0 %vm99_vm1, %v1867_v2  ;;  %v2123_v4 = vld [vmem:[#allocation2] sm:$0xff]   ;;  %v2134_v7 = vld [vmem:[#allocation2 + $0x8] sm:$0xff]   ;;  %v2150_v10 = vld [vmem:[%s2712_s2 + $0x10] sm:$0xff]   ;;  %v59_v14 = vand.u32 127, %v58_v13  ;;  %s2037_s11 = smov 32   ;;  %s2038_s6 = smov 96  }
  0x28   :  { %v2128_v5 = vld [vmem:[%s2712_s2] sm:$0xff]   ;;  %1678 = vmatprep.subr.bf16.mxu1 %v2035_v6  ;;  %1698 = vmatprep.subr.bf16.mxu0 %v2035_v6  ;;  %v2139_v8 = vld [vmem:[%s2712_s2 + $0x8] sm:$0xff]   ;;  %v2156_v11 = vld [vmem:[#allocation2 + $0x18] sm:$0xff]  }
  0x29   :  { %1679 = vmatpush3.bf16.msra.mxu1 %v2123_v4  ;;  %v2161_v12 = vld [vmem:[%s2712_s2 + $0x18] sm:$0xff]   ;;  %v2172_v15 = vld [vmem:[%s2713_s3] ss:$0 sm:$0xff]  ;;  %vm60_vm2 = vcmp.ge.s32.totalorder %v59_v14, 64  ;;  %vm61_vm3 = vcmp.lt.s32.totalorder %v59_v14, 96  ;;  %v1879_v26 = vld [vmem:[%s2710_s0 + $0x10] sm:$0xff]   ;;  %1694 = vmatprep.mubr.msk.bf16.mxu1 %vm2036_vm5, %v2035_v6 }
  0x2a   :  { %1671 = vmatmul.mubr.msk.bf16.vlgmr.msra.gmra.mrb[0].mxu0 %vm99_vm1, %v1868_v3  ;;  %1680 = vmatprep.subr.bf16.mxu1 %v2035_v6  ;;  %vm2179_vm4 = vmand %vm60_vm2, %vm61_vm3  ;;  %v2187_v24 = vld [vmem:[#allocation2 + $0x20] sm:$0xff]   ;;  %v1880_v27 = vld [vmem:[%s2710_s0 + $0x18] sm:$0xff]  }
  0x2b   :  { %1699 = vmatpush3.bf16.msra.mxu0 %v2128_v5  ;;  %v2192_v25 = vld [vmem:[%s2712_s2 + $0x20] sm:$0xff]   ;;  %v2204_v28 = vld [vmem:[#allocation2 + $0x28] sm:$0xff]   ;;  %1674 = vmatprep.mubr.msk.bf16.mxu0 %vm99_vm1, %v1879_v26  ;;  %v2217_v32 = vld [vmem:[#allocation2 + $0x30] sm:$0xff]  }
  0x2c   :  { %1700 = vmatprep.subr.bf16.mxu0 %v2035_v6  ;;  %v2209_v29 = vld [vmem:[%s2712_s2 + $0x28] sm:$0xff]   ;;  %v2222_v33 = vld [vmem:[%s2712_s2 + $0x30] sm:$0xff]   ;;  %v2230_v36 = vld [vmem:[#allocation2 + $0x38] sm:$0xff]  }
  0x2d   :  { %1681 = vmatpush3.bf16.msra.mxu1 %v2134_v7  ;;  %v2235_v37 = vld [vmem:[%s2712_s2 + $0x38] sm:$0xff]   ;;  %v2275_v48 = vld [vmem:[#allocation2 + $0x40] sm:$0xff]   ;;  %v2277_v49 = vld [vmem:[#allocation2 + $0x48] sm:$0xff]  }
  0x2e   :  { %1682 = vmatprep.subr.bf16.mxu1 %v2035_v6  ;;  %v2286_v50 = vld [vmem:[%s2715_s5] ss:$0 sm:$0xff]  ;;  %v2295_v2 = vld [vmem:[#allocation2 + $0x50] sm:$0xff]   ;;  %v2299_v3 = vld [vmem:[#allocation2 + $0x58] sm:$0xff]  }
  0x2f   :  { %1701 = vmatpush3.bf16.msra.mxu0 %v2139_v8  ;;  %v2303_v13 = vld [vmem:[#allocation2 + $0x60] sm:$0xff]  }
  0x30   :  { %1702 = vmatprep.subr.bf16.mxu0 %v2035_v6 }
  0x31   :  { %1683 = vmatpush3.bf16.msra.mxu1 %v2145_v9 }
  0x32   :  { %1684 = vmatprep.subr.bf16.mxu1 %v2035_v6  ;;  %1675 = vmatmul.mubr.msk.bf16.gmra.mrb[4].mxu0 %vm99_vm1, %v1880_v27 }
  0x33   :  { %1703 = vmatpush3.bf16.msra.mxu0 %v2150_v10  ;;  %1714 = vmatprep.mubr.msk.bf16.mxu0 %vm2036_vm5, %v2035_v6 }
  0x34   :  { %1704 = vmatprep.subr.bf16.mxu0 %v2035_v6 }
  0x35   :  { %1685 = vmatpush3.bf16.msra.mxu1 %v2156_v11 }
  0x36   :  { %1686 = vmatprep.subr.bf16.mxu1 %v2035_v6 }
  0x37   :  { %1705 = vmatpush3.bf16.msra.mxu0 %v2161_v12 }
  0x38   :  { %1706 = vmatprep.subr.bf16.mxu0 %v2035_v6 }
  0x39   :  { %1687 = vmatpush3.bf16.msra.mxu1 %v2187_v24 }
  0x3a   :  { %1688 = vmatprep.subr.bf16.mxu1 %v2035_v6 }
  0x3b   :  { %1707 = vmatpush3.bf16.msra.mxu0 %v2192_v25 }
  0x3c   :  { %1708 = vmatprep.subr.bf16.mxu0 %v2035_v6 }
  0x3d   :  { %1689 = vmatpush3.bf16.msra.mxu1 %v2204_v28 }
  0x3e   :  { %1690 = vmatprep.subr.bf16.mxu1 %v2035_v6 }
  0x3f   :  { %1709 = vmatpush3.bf16.msra.mxu0 %v2209_v29 }
  0x40   :  { %1710 = vmatprep.subr.bf16.mxu0 %v2035_v6 }
  0x41   :  { %1691 = vmatpush3.bf16.msra.mxu1 %v2217_v32 }
  0x42   :  { %1692 = vmatprep.subr.bf16.mxu1 %v2035_v6 }
  0x43   :  { %1711 = vmatpush3.bf16.msra.mxu0 %v2222_v33 }
  0x44   :  { %1712 = vmatprep.subr.bf16.mxu0 %v2035_v6 }
  0x45   :  { %1693 = vmatpush3.bf16.msra.mxu1 %v2230_v36 }
  0x46   :  { %1451 = vmatprep.subr.bf16.mxu1 %v2275_v48 }
  0x47   :  { %1713 = vmatpush3.bf16.msra.mxu0 %v2235_v37 }
  0x48   :  { %1718 = vmatprep.subr.bf16.mxu0 %v2035_v6 }
  0xfd   :  { %v2174_v16 = vpop.f32.mrb[0].mxu0 }
  0xfe   :  { %v150_v17 = vpop.f32.mrb[1].mxu0 }
  0xff   :  { %v151_v18 = vadd.f32 %v2172_v15, %v150_v17  ;;  %v2177_v19 = vpop.f32.mrb[2].mxu0 }
 0x100   :  { %v2183_v21 = vpop.f32.mrb[3].mxu0 }
 0x101   :  { %v236_v22 = vmul.f32 0.5, %v151_v18  ;;  %v154_v51 = vadd.f32 %v2172_v15, %v2183_v21 }
 0x103   :  { %v237_v23 = vsel %vm2179_vm4, %v151_v18, %v236_v22 }
 0x104   :  { %1903 = vtanh.f32 %v237_v23  ;;  %v2307_v23 = vld [vmem:[#allocation2 + $0x68] sm:$0xff]  }
 0x105   :  { %v2267_v44 = vpop.f32.mrb[4].mxu0 }
 0x106   :  { %v2269_v45 = vpop.f32.mrb[5].mxu0 }
 0x107   :  { %v2271_v46 = vpop.f32.mrb[6].mxu0 }
 0x108   :  { %v2273_v47 = vpop.f32.mrb[7].mxu0 }
 0x10e   :  { %v1904_v30 = vpop.eup %1903 }
 0x10f   :  { %v239_v31 = vmul.f32 0.5, %v1904_v30 }
 0x111   :  { %v240_v34 = vadd.f32 0.5, %v239_v31  ;;  %v2317_v31 = vld [vmem:[#allocation2 + $0x70] sm:$0xff]  }
 0x113   :  { %v241_v35 = vsel %vm2179_vm4, %v1904_v30, %v240_v34  ;;  %v2323_v34 = vld [vmem:[#allocation2 + $0x78] sm:$0xff]  }
 0x114   :  { %242 = vrot.lane.b32.xlu0 %v241_v35, %s2032_s15 }
 0x118   :  { %245 = vrot.lane.b32.xlu0 %v241_v35, %s2037_s11 }
 0x186   :  { %v243_v38 = vpop.permute.xlu0 %242 }
 0x187   :  { %v2246_v39 = vmul.f32 %v243_v38, %v241_v35 }
 0x189   :  { %1905 = vtanh.f32 %v2246_v39 }
 0x18a   :  { %v246_v41 = vpop.permute.xlu0 %245 }
 0x193   :  { %v1906_v40 = vpop.eup %1905 }
 0x194   :  { %v248_v42 = vmul.f32 %v1906_v40, %v246_v41 }
 0x196   :  { %v249_v43 = vpack.c.bf16 %v248_v42, %v248_v42 }
 0x198   :  { %1695 = vmatmul.mubr.bf16.vlgmr.msra.gmra.mrb[0].mxu1 %v249_v43  ;;  %1715 = vmatmul.mubr.bf16.vlgmr.msra.gmra.mrb[8].mxu0 %v249_v43 }
 0x199   :  { %1719 = vmatpush3.bf16.msra.mxu0 %v2128_v5  ;;  %1734 = vmatprep.mubr.msk.bf16.mxu0 %vm2036_vm5, %v2035_v6 }
 0x19a   :  { %1720 = vmatprep.subr.bf16.mxu0 %v2035_v6  ;;  %1452 = vmatpush3.bf16.msra.mxu1 %v2123_v4 }
 0x19b   :  { %1453 = vmatprep.subr.bf16.mxu1 %v2277_v49 }
 0x19d   :  { %1721 = vmatpush3.bf16.msra.mxu0 %v2139_v8 }
 0x19e   :  { %1722 = vmatprep.subr.bf16.mxu0 %v2035_v6  ;;  %1454 = vmatpush3.bf16.msra.mxu1 %v2134_v7 }
 0x19f   :  { %1455 = vmatprep.subr.bf16.mxu1 %v2295_v2 }
 0x1a1   :  { %1723 = vmatpush3.bf16.msra.mxu0 %v2150_v10 }
 0x1a2   :  { %1724 = vmatprep.subr.bf16.mxu0 %v2035_v6  ;;  %1456 = vmatpush3.bf16.msra.mxu1 %v2145_v9 }
 0x1a3   :  { %1457 = vmatprep.subr.bf16.mxu1 %v2299_v3 }
 0x1a5   :  { %1725 = vmatpush3.bf16.msra.mxu0 %v2161_v12 }
 0x1a6   :  { %1726 = vmatprep.subr.bf16.mxu0 %v2035_v6  ;;  %1458 = vmatpush3.bf16.msra.mxu1 %v2156_v11 }
 0x1a7   :  { %1459 = vmatprep.subr.bf16.mxu1 %v2303_v13 }
 0x1a9   :  { %1727 = vmatpush3.bf16.msra.mxu0 %v2192_v25 }
 0x1aa   :  { %1728 = vmatprep.subr.bf16.mxu0 %v2035_v6  ;;  %1460 = vmatpush3.bf16.msra.mxu1 %v2187_v24 }
 0x1ab   :  { %1461 = vmatprep.subr.bf16.mxu1 %v2307_v23 }
 0x1ad   :  { %1729 = vmatpush3.bf16.msra.mxu0 %v2209_v29 }
 0x1ae   :  { %1730 = vmatprep.subr.bf16.mxu0 %v2035_v6  ;;  %1462 = vmatpush3.bf16.msra.mxu1 %v2204_v28 }
 0x1af   :  { %1463 = vmatprep.subr.bf16.mxu1 %v2317_v31 }
 0x1b1   :  { %1731 = vmatpush3.bf16.msra.mxu0 %v2222_v33 }
 0x1b2   :  { %1732 = vmatprep.subr.bf16.mxu0 %v2035_v6  ;;  %1464 = vmatpush3.bf16.msra.mxu1 %v2217_v32 }
 0x1b3   :  { %1465 = vmatprep.subr.bf16.mxu1 %v2323_v34 }
 0x1b5   :  { %1733 = vmatpush3.bf16.msra.mxu0 %v2235_v37 }
 0x1b6   :  { %1738 = vmatprep.subr.bf16.mxu0 %v2035_v6  ;;  %1466 = vmatpush3.bf16.msra.mxu1 %v2230_v36 }
 0x1b7   :  { %1482 = vmatprep.subr.bf16.mxu1 %v2275_v48 }
 0x26b   :  { %v332_v52 = vpop.f32.mrb[0].mxu1  ;;  %v433_v53 = vpop.f32.mrb[8].mxu0 }
 0x26c   :  { %v333_v54 = vadd.f32 %v2286_v50, %v332_v52  ;;  %v439_v55 = vadd.f32 %v433_v53, %v154_v51  ;;  %v1696_v56 = vpop.f32.mrb[1].mxu1  ;;  %v1716_v57 = vpop.f32.mrb[9].mxu0 }
 0x26d   :  { %v335_v58 = vpop.f32.mrb[2].mxu1  ;;  %v436_v59 = vpop.f32.mrb[10].mxu0 }
 0x26e   :  { %v338_v60 = vmul.f32 0.5, %v333_v54  ;;  %v440_v61 = vmul.f32 0.5, %v439_v55  ;;  %v1697_v62 = vpop.f32.mrb[3].mxu1  ;;  %v1717_v63 = vpop.f32.mrb[11].mxu0 }
 0x270   :  { %v339_v0 = vsel %vm2179_vm4, %v333_v54, %v338_v60  ;;  %v441_v1 = vsel %vm2179_vm4, %v439_v55, %v440_v61 }
 0x271   :  { %1907 = vtanh.f32 %v339_v0 }
 0x272   :  { %1909 = vtanh.f32 %v441_v1 }
 0x27b   :  { %v1908_v14 = vpop.eup %1907 }
 0x27c   :  { %v1910_v17 = vpop.eup %1909  ;;  %v341_v18 = vmul.f32 0.5, %v1908_v14 }
 0x27d   :  { %v443_v21 = vmul.f32 0.5, %v1910_v17 }
 0x27e   :  { %v342_v22 = vadd.f32 0.5, %v341_v18 }
 0x27f   :  { %v444_v26 = vadd.f32 0.5, %v443_v21 }
 0x280   :  { %v343_v27 = vsel %vm2179_vm4, %v1908_v14, %v342_v22 }
 0x281   :  { %v445_v30 = vsel %vm2179_vm4, %v1910_v17, %v444_v26  ;;  %344 = vrot.lane.b32.xlu0 %v343_v27, %s2032_s15 }
 0x282   :  { %446 = vrot.lane.b32.xlu1 %v445_v30, %s2032_s15 }
 0x285   :  { %453 = vrot.lane.b32.xlu0 %v445_v30, %s2037_s11 }
 0x286   :  { %449 = vrot.lane.b32.xlu1 %v445_v30, %s2038_s6 }
 0x28a   :  { %347 = vrot.lane.b32.xlu1 %v343_v27, %s2037_s11 }
 0x2f3   :  { %v345_v35 = vpop.permute.xlu0 %344 }
 0x2f4   :  { %v447_v38 = vpop.permute.xlu1 %446  ;;  %v2329_v40 = vmul.f32 %v345_v35, %v343_v27 }
 0x2f5   :  { %v448_v42 = vmul.f32 %v447_v38, %v445_v30 }
 0x2f6   :  { %1911 = vtanh.f32 %v2329_v40 }
 0x2f7   :  { %v454_v57 = vpop.permute.xlu0 %453 }
 0x2f8   :  { %v450_v41 = vpop.permute.xlu1 %449 }
 0x2f9   :  { %v451_v43 = vmul.f32 %v450_v41, %v2246_v39  ;;  %v159_v39 = vadd.f32 %v2174_v16, %v2172_v15 }
 0x2fb   :  { %v2333_v51 = vadd.f32 %v451_v43, %v448_v42 }
 0x2fc   :  { %v348_v53 = vpop.permute.xlu1 %347 }
 0x2fd   :  { %1913 = vtanh.f32 %v2333_v51 }
 0x300   :  { %v1912_v52 = vpop.eup %1911 }
 0x301   :  { %v350_v54 = vmul.f32 %v1912_v52, %v348_v53 }
 0x303   :  { %v458_v55 = vpack.c.bf16 %v350_v54, %v350_v54 }
 0x305   :  { %539 = vmatprep.mubr.bf16.mxu1 %v458_v55 }
 0x307   :  { %v1914_v56 = vpop.eup %1913 }
 0x308   :  { %v456_v58 = vmul.f32 %v1914_v56, %v454_v57 }
 0x30a   :  { %v457_v59 = vpack.c.bf16 %v456_v58, %v456_v58 }
 0x30c   :  { %540 = vmatmul.mubr.bf16.vlgmr.msra.gmra.mrb[4].mxu1 %v457_v59  ;;  %1735 = vmatmul.mubr.bf16.vlgmr.msra.gmra.mrb[12].mxu0 %v457_v59 }
 0x30d   :  { %1483 = vmatpush3.bf16.msra.mxu1 %v2123_v4  ;;  %1739 = vmatpush3.bf16.msra.mxu0 %v2128_v5 }
 0x30e   :  { %1484 = vmatprep.subr.bf16.mxu1 %v2277_v49  ;;  %1740 = vmatprep.subr.bf16.mxu0 %v2035_v6 }
 0x30f   :  { %1754 = vmatprep.mubr.msk.bf16.mxu0 %vm2036_vm5, %v2035_v6 }
 0x311   :  { %1485 = vmatpush3.bf16.msra.mxu1 %v2134_v7  ;;  %1741 = vmatpush3.bf16.msra.mxu0 %v2139_v8 }
 0x312   :  { %1486 = vmatprep.subr.bf16.mxu1 %v2295_v2  ;;  %1742 = vmatprep.subr.bf16.mxu0 %v2035_v6 }
 0x315   :  { %1487 = vmatpush3.bf16.msra.mxu1 %v2145_v9  ;;  %1743 = vmatpush3.bf16.msra.mxu0 %v2150_v10 }
 0x316   :  { %1488 = vmatprep.subr.bf16.mxu1 %v2299_v3  ;;  %1744 = vmatprep.subr.bf16.mxu0 %v2035_v6 }
 0x319   :  { %1489 = vmatpush3.bf16.msra.mxu1 %v2156_v11  ;;  %1745 = vmatpush3.bf16.msra.mxu0 %v2161_v12 }
 0x31a   :  { %1490 = vmatprep.subr.bf16.mxu1 %v2303_v13  ;;  %1746 = vmatprep.subr.bf16.mxu0 %v2035_v6 }
 0x31d   :  { %1491 = vmatpush3.bf16.msra.mxu1 %v2187_v24  ;;  %1747 = vmatpush3.bf16.msra.mxu0 %v2192_v25 }
 0x31e   :  { %1492 = vmatprep.subr.bf16.mxu1 %v2307_v23  ;;  %1748 = vmatprep.subr.bf16.mxu0 %v2035_v6 }
 0x321   :  { %1493 = vmatpush3.bf16.msra.mxu1 %v2204_v28  ;;  %1749 = vmatpush3.bf16.msra.mxu0 %v2209_v29 }
 0x322   :  { %1494 = vmatprep.subr.bf16.mxu1 %v2317_v31  ;;  %1750 = vmatprep.subr.bf16.mxu0 %v2035_v6 }
 0x325   :  { %1495 = vmatpush3.bf16.msra.mxu1 %v2217_v32  ;;  %1751 = vmatpush3.bf16.msra.mxu0 %v2222_v33 }
 0x326   :  { %1496 = vmatprep.subr.bf16.mxu1 %v2323_v34  ;;  %1752 = vmatprep.subr.bf16.mxu0 %v2035_v6 }
 0x329   :  { %1497 = vmatpush3.bf16.msra.mxu1 %v2230_v36  ;;  %1753 = vmatpush3.bf16.msra.mxu0 %v2235_v37 }
 0x32a   :  { %1513 = vmatprep.subr.bf16.mxu1 %v2275_v48  ;;  %1758 = vmatprep.subr.bf16.mxu0 %v2035_v6 }
 0x3df   :  { %v1467_v60 = vpop.f32.mrb[4].mxu1  ;;  %v598_v61 = vpop.f32.mrb[12].mxu0 }
 0x3e0   :  { %v604_v62 = vadd.f32 %v598_v61, %v159_v39  ;;  %v1468_v63 = vpop.f32.mrb[5].mxu1  ;;  %v1736_v0 = vpop.f32.mrb[13].mxu0 }
 0x3e1   :  { %v1469_v1 = vadd.f32 %v1468_v63, %v1467_v60  ;;  %v1470_v14 = vpop.f32.mrb[6].mxu1  ;;  %v601_v17 = vpop.f32.mrb[14].mxu0 }
 0x3e2   :  { %v605_v18 = vmul.f32 0.5, %v604_v62  ;;  %v1471_v21 = vpop.f32.mrb[7].mxu1  ;;  %v1737_v22 = vpop.f32.mrb[15].mxu0 }
 0x3e3   :  { %v542_v26 = vadd.f32 %v1469_v1, %v2286_v50 }
 0x3e4   :  { %v606_v27 = vsel %vm2179_vm4, %v604_v62, %v605_v18 }
 0x3e5   :  { %v547_v30 = vmul.f32 0.5, %v542_v26  ;;  %1915 = vtanh.f32 %v606_v27 }
 0x3e7   :  { %v548_v16 = vsel %vm2179_vm4, %v542_v26, %v547_v30 }
 0x3e8   :  { %1917 = vtanh.f32 %v548_v16 }
 0x3ef   :  { %v1916_v35 = vpop.eup %1915 }
 0x3f0   :  { %v608_v42 = vmul.f32 0.5, %v1916_v35 }
 0x3f2   :  { %v1918_v38 = vpop.eup %1917  ;;  %v609_v53 = vadd.f32 0.5, %v608_v42 }
 0x3f3   :  { %v550_v41 = vmul.f32 0.5, %v1918_v38 }
 0x3f4   :  { %v610_v54 = vsel %vm2179_vm4, %v1916_v35, %v609_v53 }
 0x3f5   :  { %v551_v43 = vadd.f32 0.5, %v550_v41 }
 0x3f7   :  { %v552_v52 = vsel %vm2179_vm4, %v1918_v38, %v551_v43 }
 0x3f8   :  { %556 = vrot.lane.b32.xlu0 %v552_v52, %s2038_s6  ;;  %553 = vrot.lane.b32.xlu1 %v552_v52, %s2032_s15 }
 0x3fc   :  { %614 = vrot.lane.b32.xlu0 %v610_v54, %s2038_s6  ;;  %611 = vrot.lane.b32.xlu1 %v610_v54, %s2032_s15 }
 0x400   :  { %618 = vrot.lane.b32.xlu0 %v610_v54, %s2037_s11  ;;  %560 = vrot.lane.b32.xlu1 %v552_v52, %s2037_s11 }
 0x46a   :  { %v557_v55 = vpop.permute.xlu0 %556  ;;  %v554_v56 = vpop.permute.xlu1 %553 }
 0x46b   :  { %v558_v57 = vmul.f32 %v557_v55, %v2329_v40  ;;  %v555_v58 = vmul.f32 %v554_v56, %v552_v52 }
 0x46d   :  { %v2388_v59 = vadd.f32 %v558_v57, %v555_v58 }
 0x46e   :  { %v615_v39 = vpop.permute.xlu0 %614  ;;  %v612_v60 = vpop.permute.xlu1 %611 }
 0x46f   :  { %1919 = vtanh.f32 %v2388_v59  ;;  %v616_v61 = vmul.f32 %v615_v39, %v2333_v51  ;;  %v613_v62 = vmul.f32 %v612_v60, %v610_v54  ;;  %v162_v51 = vadd.f32 %v2177_v19, %v2172_v15 }
 0x471   :  { %v2392_v63 = vadd.f32 %v616_v61, %v613_v62 }
 0x472   :  { %v561_v1 = vpop.permute.xlu1 %560  ;;  %v619_v40 = vpop.permute.xlu0 %618 }
 0x473   :  { %1921 = vtanh.f32 %v2392_v63 }
 0x479   :  { %v1920_v0 = vpop.eup %1919 }
 0x47a   :  { %v563_v14 = vmul.f32 %v1920_v0, %v561_v1 }
 0x47c   :  { %v623_v17 = vpack.c.bf16 %v563_v14, %v563_v14 }
 0x47d   :  { %v1922_v18 = vpop.eup %1921 }
 0x47e   :  { %v621_v21 = vmul.f32 %v1922_v18, %v619_v40  ;;  %656 = vmatprep.mubr.bf16.mxu1 %v623_v17 }
 0x480   :  { %v622_v22 = vpack.c.bf16 %v621_v21, %v621_v21 }
 0x482   :  { %657 = vmatmul.mubr.bf16.vlgmr.msra.gmra.mrb[8].mxu1 %v622_v22  ;;  %1755 = vmatmul.mubr.bf16.vlgmr.msra.gmra.mrb[16].mxu0 %v622_v22 }
 0x483   :  { %1514 = vmatpush3.bf16.msra.mxu1 %v2123_v4  ;;  %1759 = vmatpush3.bf16.msra.mxu0 %v2128_v5 }
 0x484   :  { %1515 = vmatprep.subr.bf16.mxu1 %v2277_v49  ;;  %1760 = vmatprep.subr.bf16.mxu0 %v2035_v6 }
 0x485   :  { %1774 = vmatprep.mubr.msk.bf16.mxu0 %vm2036_vm5, %v2035_v6 }
 0x487   :  { %1516 = vmatpush3.bf16.msra.mxu1 %v2134_v7  ;;  %1761 = vmatpush3.bf16.msra.mxu0 %v2139_v8 }
 0x488   :  { %1517 = vmatprep.subr.bf16.mxu1 %v2295_v2  ;;  %1762 = vmatprep.subr.bf16.mxu0 %v2035_v6 }
 0x48b   :  { %1518 = vmatpush3.bf16.msra.mxu1 %v2145_v9  ;;  %1763 = vmatpush3.bf16.msra.mxu0 %v2150_v10 }
 0x48c   :  { %1519 = vmatprep.subr.bf16.mxu1 %v2299_v3  ;;  %1764 = vmatprep.subr.bf16.mxu0 %v2035_v6 }
 0x48f   :  { %1520 = vmatpush3.bf16.msra.mxu1 %v2156_v11  ;;  %1765 = vmatpush3.bf16.msra.mxu0 %v2161_v12 }
 0x490   :  { %1521 = vmatprep.subr.bf16.mxu1 %v2303_v13  ;;  %1766 = vmatprep.subr.bf16.mxu0 %v2035_v6 }
 0x493   :  { %1522 = vmatpush3.bf16.msra.mxu1 %v2187_v24  ;;  %1767 = vmatpush3.bf16.msra.mxu0 %v2192_v25 }
 0x494   :  { %1523 = vmatprep.subr.bf16.mxu1 %v2307_v23  ;;  %1768 = vmatprep.subr.bf16.mxu0 %v2035_v6 }
 0x497   :  { %1524 = vmatpush3.bf16.msra.mxu1 %v2204_v28  ;;  %1769 = vmatpush3.bf16.msra.mxu0 %v2209_v29 }
 0x498   :  { %1525 = vmatprep.subr.bf16.mxu1 %v2317_v31  ;;  %1770 = vmatprep.subr.bf16.mxu0 %v2035_v6 }
 0x49b   :  { %1526 = vmatpush3.bf16.msra.mxu1 %v2217_v32  ;;  %1771 = vmatpush3.bf16.msra.mxu0 %v2222_v33 }
 0x49c   :  { %1527 = vmatprep.subr.bf16.mxu1 %v2323_v34  ;;  %1772 = vmatprep.subr.bf16.mxu0 %v2035_v6 }
 0x49f   :  { %1528 = vmatpush3.bf16.msra.mxu1 %v2230_v36  ;;  %1773 = vmatpush3.bf16.msra.mxu0 %v2235_v37 }
 0x4a0   :  { %1544 = vmatprep.subr.bf16.mxu1 %v2275_v48  ;;  %1778 = vmatprep.subr.bf16.mxu0 %v2035_v6 }
 0x555   :  { %v1498_v26 = vpop.f32.mrb[8].mxu1  ;;  %v715_v27 = vpop.f32.mrb[16].mxu0 }
 0x556   :  { %v721_v30 = vadd.f32 %v715_v27, %v162_v51  ;;  %v1499_v16 = vpop.f32.mrb[9].mxu1  ;;  %v1756_v35 = vpop.f32.mrb[17].mxu0 }
 0x557   :  { %v1500_v38 = vadd.f32 %v1499_v16, %v1498_v26  ;;  %v1501_v41 = vpop.f32.mrb[10].mxu1  ;;  %v718_v42 = vpop.f32.mrb[18].mxu0 }
 0x558   :  { %v722_v43 = vmul.f32 0.5, %v721_v30  ;;  %v1502_v52 = vpop.f32.mrb[11].mxu1  ;;  %v1757_v53 = vpop.f32.mrb[19].mxu0 }
 0x559   :  { %v659_v54 = vadd.f32 %v1500_v38, %v2286_v50 }
 0x55a   :  { %v723_v55 = vsel %vm2179_vm4, %v721_v30, %v722_v43 }
 0x55b   :  { %v664_v56 = vmul.f32 0.5, %v659_v54  ;;  %1923 = vtanh.f32 %v723_v55 }
 0x55d   :  { %v665_v19 = vsel %vm2179_vm4, %v659_v54, %v664_v56 }
 0x55e   :  { %1925 = vtanh.f32 %v665_v19 }
 0x565   :  { %v1924_v57 = vpop.eup %1923 }
 0x566   :  { %v725_v60 = vmul.f32 0.5, %v1924_v57 }
 0x568   :  { %v1926_v58 = vpop.eup %1925  ;;  %v726_v0 = vadd.f32 0.5, %v725_v60 }
 0x569   :  { %v667_v39 = vmul.f32 0.5, %v1926_v58 }
 0x56a   :  { %v727_v1 = vsel %vm2179_vm4, %v1924_v57, %v726_v0 }
 0x56b   :  { %v668_v61 = vadd.f32 0.5, %v667_v39 }
 0x56d   :  { %v669_v62 = vsel %vm2179_vm4, %v1926_v58, %v668_v61 }
 0x56e   :  { %673 = vrot.lane.b32.xlu0 %v669_v62, %s2038_s6  ;;  %670 = vrot.lane.b32.xlu1 %v669_v62, %s2032_s15 }
 0x572   :  { %731 = vrot.lane.b32.xlu0 %v727_v1, %s2038_s6  ;;  %728 = vrot.lane.b32.xlu1 %v727_v1, %s2032_s15 }
 0x576   :  { %735 = vrot.lane.b32.xlu0 %v727_v1, %s2037_s11  ;;  %677 = vrot.lane.b32.xlu1 %v669_v62, %s2037_s11 }
 0x5e0   :  { %v674_v14 = vpop.permute.xlu0 %673  ;;  %v671_v17 = vpop.permute.xlu1 %670 }
 0x5e1   :  { %v675_v18 = vmul.f32 %v674_v14, %v2388_v59  ;;  %v672_v40 = vmul.f32 %v671_v17, %v669_v62 }
 0x5e3   :  { %v2447_v21 = vadd.f32 %v675_v18, %v672_v40 }
 0x5e4   :  { %v732_v22 = vpop.permute.xlu0 %731  ;;  %v729_v51 = vpop.permute.xlu1 %728 }
 0x5e5   :  { %1927 = vtanh.f32 %v2447_v21  ;;  %v733_v26 = vmul.f32 %v732_v22, %v2392_v63  ;;  %v730_v27 = vmul.f32 %v729_v51, %v727_v1  ;;  %v167_v63 = vadd.f32 %v2172_v15, %v2269_v45 }
 0x5e7   :  { %v2451_v30 = vadd.f32 %v733_v26, %v730_v27 }
 0x5e8   :  { %v678_v35 = vpop.permute.xlu1 %677  ;;  %v736_v59 = vpop.permute.xlu0 %735 }
 0x5e9   :  { %1929 = vtanh.f32 %v2451_v30 }
 0x5ef   :  { %v1928_v16 = vpop.eup %1927 }
 0x5f0   :  { %v680_v38 = vmul.f32 %v1928_v16, %v678_v35 }
 0x5f2   :  { %v740_v41 = vpack.c.bf16 %v680_v38, %v680_v38 }
 0x5f3   :  { %v1930_v42 = vpop.eup %1929 }
 0x5f4   :  { %v738_v43 = vmul.f32 %v1930_v42, %v736_v59  ;;  %773 = vmatprep.mubr.bf16.mxu1 %v740_v41 }
 0x5f6   :  { %v739_v52 = vpack.c.bf16 %v738_v43, %v738_v43 }
 0x5f8   :  { %774 = vmatmul.mubr.bf16.vlgmr.msra.gmra.mrb[12].mxu1 %v739_v52  ;;  %1775 = vmatmul.mubr.bf16.vlgmr.msra.gmra.mrb[20].mxu0 %v739_v52 }
 0x5f9   :  { %1545 = vmatpush3.bf16.msra.mxu1 %v2123_v4  ;;  %1779 = vmatpush3.bf16.msra.mxu0 %v2128_v5 }
 0x5fa   :  { %1546 = vmatprep.subr.bf16.mxu1 %v2277_v49  ;;  %1780 = vmatprep.subr.bf16.mxu0 %v2035_v6 }
 0x5fb   :  { %1794 = vmatprep.mubr.msk.bf16.mxu0 %vm2036_vm5, %v2035_v6 }
 0x5fd   :  { %1547 = vmatpush3.bf16.msra.mxu1 %v2134_v7  ;;  %1781 = vmatpush3.bf16.msra.mxu0 %v2139_v8 }
 0x5fe   :  { %1548 = vmatprep.subr.bf16.mxu1 %v2295_v2  ;;  %1782 = vmatprep.subr.bf16.mxu0 %v2035_v6 }
 0x601   :  { %1549 = vmatpush3.bf16.msra.mxu1 %v2145_v9  ;;  %1783 = vmatpush3.bf16.msra.mxu0 %v2150_v10 }
 0x602   :  { %1550 = vmatprep.subr.bf16.mxu1 %v2299_v3  ;;  %1784 = vmatprep.subr.bf16.mxu0 %v2035_v6 }
 0x605   :  { %1551 = vmatpush3.bf16.msra.mxu1 %v2156_v11  ;;  %1785 = vmatpush3.bf16.msra.mxu0 %v2161_v12 }
 0x606   :  { %1552 = vmatprep.subr.bf16.mxu1 %v2303_v13  ;;  %1786 = vmatprep.subr.bf16.mxu0 %v2035_v6 }
 0x609   :  { %1553 = vmatpush3.bf16.msra.mxu1 %v2187_v24  ;;  %1787 = vmatpush3.bf16.msra.mxu0 %v2192_v25 }
 0x60a   :  { %1554 = vmatprep.subr.bf16.mxu1 %v2307_v23  ;;  %1788 = vmatprep.subr.bf16.mxu0 %v2035_v6 }
 0x60d   :  { %1555 = vmatpush3.bf16.msra.mxu1 %v2204_v28  ;;  %1789 = vmatpush3.bf16.msra.mxu0 %v2209_v29 }
 0x60e   :  { %1556 = vmatprep.subr.bf16.mxu1 %v2317_v31  ;;  %1790 = vmatprep.subr.bf16.mxu0 %v2035_v6 }
 0x611   :  { %1557 = vmatpush3.bf16.msra.mxu1 %v2217_v32  ;;  %1791 = vmatpush3.bf16.msra.mxu0 %v2222_v33 }
 0x612   :  { %1558 = vmatprep.subr.bf16.mxu1 %v2323_v34  ;;  %1792 = vmatprep.subr.bf16.mxu0 %v2035_v6 }
 0x615   :  { %1559 = vmatpush3.bf16.msra.mxu1 %v2230_v36  ;;  %1793 = vmatpush3.bf16.msra.mxu0 %v2235_v37 }
 0x616   :  { %1575 = vmatprep.subr.bf16.mxu1 %v2275_v48  ;;  %1798 = vmatprep.subr.bf16.mxu0 %v2035_v6 }
 0x6cb   :  { %v1529_v53 = vpop.f32.mrb[12].mxu1  ;;  %v832_v54 = vpop.f32.mrb[20].mxu0 }
 0x6cc   :  { %v838_v55 = vadd.f32 %v832_v54, %v167_v63  ;;  %v1530_v56 = vpop.f32.mrb[13].mxu1  ;;  %v1776_v19 = vpop.f32.mrb[21].mxu0 }
 0x6cd   :  { %v1531_v57 = vadd.f32 %v1530_v56, %v1529_v53  ;;  %v1532_v58 = vpop.f32.mrb[14].mxu1  ;;  %v835_v39 = vpop.f32.mrb[22].mxu0 }
 0x6ce   :  { %v839_v60 = vmul.f32 0.5, %v838_v55  ;;  %v1533_v61 = vpop.f32.mrb[15].mxu1  ;;  %v1777_v62 = vpop.f32.mrb[23].mxu0 }
 0x6cf   :  { %v776_v0 = vadd.f32 %v1531_v57, %v2286_v50 }
 0x6d0   :  { %v840_v1 = vsel %vm2179_vm4, %v838_v55, %v839_v60 }
 0x6d1   :  { %v781_v14 = vmul.f32 0.5, %v776_v0  ;;  %1931 = vtanh.f32 %v840_v1 }
 0x6d3   :  { %v782_v45 = vsel %vm2179_vm4, %v776_v0, %v781_v14 }
 0x6d4   :  { %1933 = vtanh.f32 %v782_v45 }
 0x6db   :  { %v1932_v17 = vpop.eup %1931 }
 0x6dc   :  { %v842_v22 = vmul.f32 0.5, %v1932_v17 }
 0x6de   :  { %v1934_v18 = vpop.eup %1933  ;;  %v843_v27 = vadd.f32 0.5, %v842_v22 }
 0x6df   :  { %v784_v40 = vmul.f32 0.5, %v1934_v18 }
 0x6e0   :  { %v844_v16 = vsel %vm2179_vm4, %v1932_v17, %v843_v27 }
 0x6e1   :  { %v785_v51 = vadd.f32 0.5, %v784_v40 }
 0x6e3   :  { %v786_v26 = vsel %vm2179_vm4, %v1934_v18, %v785_v51 }
 0x6e4   :  { %790 = vrot.lane.b32.xlu0 %v786_v26, %s2038_s6  ;;  %787 = vrot.lane.b32.xlu1 %v786_v26, %s2032_s15 }
 0x6e8   :  { %848 = vrot.lane.b32.xlu0 %v844_v16, %s2038_s6  ;;  %845 = vrot.lane.b32.xlu1 %v844_v16, %s2032_s15 }
 0x6ec   :  { %852 = vrot.lane.b32.xlu0 %v844_v16, %s2037_s11  ;;  %794 = vrot.lane.b32.xlu1 %v786_v26, %s2037_s11 }
 0x756   :  { %v791_v35 = vpop.permute.xlu0 %790  ;;  %v788_v38 = vpop.permute.xlu1 %787 }
 0x757   :  { %v792_v41 = vmul.f32 %v791_v35, %v2447_v21  ;;  %v789_v42 = vmul.f32 %v788_v38, %v786_v26 }
 0x759   :  { %v2506_v59 = vadd.f32 %v792_v41, %v789_v42 }
 0x75a   :  { %v849_v43 = vpop.permute.xlu0 %848  ;;  %v846_v52 = vpop.permute.xlu1 %845 }
 0x75b   :  { %1935 = vtanh.f32 %v2506_v59  ;;  %v850_v63 = vmul.f32 %v849_v43, %v2451_v30  ;;  %v847_v53 = vmul.f32 %v846_v52, %v844_v16 }
 0x75d   :  { %v2510_v54 = vadd.f32 %v850_v63, %v847_v53 }
 0x75e   :  { %v795_v56 = vpop.permute.xlu1 %794  ;;  %v853_v21 = vpop.permute.xlu0 %852 }
 0x75f   :  { %1937 = vtanh.f32 %v2510_v54 }
 0x765   :  { %v1936_v55 = vpop.eup %1935 }
 0x766   :  { %v797_v19 = vmul.f32 %v1936_v55, %v795_v56 }
 0x768   :  { %v857_v57 = vpack.c.bf16 %v797_v19, %v797_v19 }
 0x769   :  { %v1938_v58 = vpop.eup %1937 }
 0x76a   :  { %v855_v39 = vmul.f32 %v1938_v58, %v853_v21  ;;  %890 = vmatprep.mubr.bf16.mxu1 %v857_v57 }
 0x76c   :  { %v856_v60 = vpack.c.bf16 %v855_v39, %v855_v39  ;;  %v2572_v39 = vld [vmem:[#allocation2] sm:$0xff]  }
 0x76e   :  { %891 = vmatmul.mubr.bf16.vlgmr.msra.gmra.mrb[16].mxu1 %v856_v60  ;;  %1795 = vmatmul.mubr.bf16.vlgmr.msra.gmra.mrb[24].mxu0 %v856_v60  ;;  %v2582_v60 = vld [vmem:[#allocation2 + $0x8] sm:$0xff]  }
 0x76f   :  { %1576 = vmatpush3.bf16.msra.mxu1 %v2123_v4  ;;  %1799 = vmatpush3.bf16.msra.mxu0 %v2128_v5  ;;  %v170_v4 = vadd.f32 %v2172_v15, %v2273_v47 }
 0x770   :  { %1577 = vmatprep.subr.bf16.mxu1 %v2277_v49  ;;  %1800 = vmatprep.subr.bf16.mxu0 %v2035_v6 }
 0x771   :  { %1814 = vmatprep.mubr.msk.bf16.mxu0 %vm2036_vm5, %v2035_v6 }
 0x773   :  { %1578 = vmatpush3.bf16.msra.mxu1 %v2134_v7  ;;  %1801 = vmatpush3.bf16.msra.mxu0 %v2139_v8 }
 0x774   :  { %1579 = vmatprep.subr.bf16.mxu1 %v2295_v2  ;;  %1802 = vmatprep.subr.bf16.mxu0 %v2035_v6 }
 0x777   :  { %1580 = vmatpush3.bf16.msra.mxu1 %v2145_v9  ;;  %1803 = vmatpush3.bf16.msra.mxu0 %v2150_v10 }
 0x778   :  { %1581 = vmatprep.subr.bf16.mxu1 %v2299_v3  ;;  %1804 = vmatprep.subr.bf16.mxu0 %v2035_v6 }
 0x77b   :  { %1582 = vmatpush3.bf16.msra.mxu1 %v2156_v11  ;;  %1805 = vmatpush3.bf16.msra.mxu0 %v2161_v12 }
 0x77c   :  { %1583 = vmatprep.subr.bf16.mxu1 %v2303_v13  ;;  %1806 = vmatprep.subr.bf16.mxu0 %v2035_v6 }
 0x77f   :  { %1584 = vmatpush3.bf16.msra.mxu1 %v2187_v24  ;;  %1807 = vmatpush3.bf16.msra.mxu0 %v2192_v25 }
 0x780   :  { %1585 = vmatprep.subr.bf16.mxu1 %v2307_v23  ;;  %1808 = vmatprep.subr.bf16.mxu0 %v2035_v6 }
 0x783   :  { %1586 = vmatpush3.bf16.msra.mxu1 %v2204_v28  ;;  %1809 = vmatpush3.bf16.msra.mxu0 %v2209_v29 }
 0x784   :  { %1587 = vmatprep.subr.bf16.mxu1 %v2317_v31  ;;  %1810 = vmatprep.subr.bf16.mxu0 %v2035_v6 }
 0x787   :  { %1588 = vmatpush3.bf16.msra.mxu1 %v2217_v32  ;;  %1811 = vmatpush3.bf16.msra.mxu0 %v2222_v33 }
 0x788   :  { %1589 = vmatprep.subr.bf16.mxu1 %v2323_v34  ;;  %1812 = vmatprep.subr.bf16.mxu0 %v2035_v6 }
 0x78b   :  { %1590 = vmatpush3.bf16.msra.mxu1 %v2230_v36  ;;  %1813 = vmatpush3.bf16.msra.mxu0 %v2235_v37 }
 0x78c   :  { %1606 = vmatprep.subr.bf16.mxu1 %v2275_v48  ;;  %1818 = vmatprep.subr.bf16.mxu0 %v2035_v6 }
 0x841   :  { %v1560_v5 = vpop.f32.mrb[16].mxu1  ;;  %v949_v7 = vpop.f32.mrb[24].mxu0 }
 0x842   :  { %v955_v8 = vadd.f32 %v949_v7, %v170_v4  ;;  %v1561_v9 = vpop.f32.mrb[17].mxu1  ;;  %v1796_v10 = vpop.f32.mrb[25].mxu0  ;;  %v1970_v4 = vld [vmem:[%s2712_s2 + $0x8] sm:$0xff]   ;;  %v2598_v7 = vld [vmem:[#allocation2 + $0x18] sm:$0xff]  }
 0x843   :  { %v1562_v11 = vadd.f32 %v1561_v9, %v1560_v5  ;;  %v1563_v12 = vpop.f32.mrb[18].mxu1  ;;  %v952_v24 = vpop.f32.mrb[26].mxu0  ;;  %v2590_v5 = vld [vmem:[#allocation2 + $0x10] sm:$0xff]   ;;  %v2606_v9 = vld [vmem:[#allocation2 + $0x20] sm:$0xff]  }
 0x844   :  { %v956_v25 = vmul.f32 0.5, %v955_v8  ;;  %v1564_v30 = vpop.f32.mrb[19].mxu1  ;;  %v1797_v61 = vpop.f32.mrb[27].mxu0  ;;  %v1976_v10 = vld [vmem:[%s2712_s2 + $0x20] sm:$0xff]  }
 0x845   :  { %v893_v62 = vadd.f32 %v1562_v11, %v2286_v50 }
 0x846   :  { %v957_v0 = vsel %vm2179_vm4, %v955_v8, %v956_v25  ;;  %v1974_v8 = vld [vmem:[%s2712_s2 + $0x18] sm:$0xff]  }
 0x847   :  { %v898_v1 = vmul.f32 0.5, %v893_v62  ;;  %1939 = vtanh.f32 %v957_v0 }
 0x849   :  { %v899_v15 = vsel %vm2179_vm4, %v893_v62, %v898_v1 }
 0x84a   :  { %1941 = vtanh.f32 %v899_v15 }
 0x851   :  { %v1940_v47 = vpop.eup %1939 }
 0x852   :  { %v959_v17 = vmul.f32 0.5, %v1940_v47 }
 0x854   :  { %v1942_v14 = vpop.eup %1941  ;;  %v960_v22 = vadd.f32 0.5, %v959_v17 }
 0x855   :  { %v901_v45 = vmul.f32 0.5, %v1942_v14 }
 0x856   :  { %v961_v51 = vsel %vm2179_vm4, %v1940_v47, %v960_v22 }
 0x857   :  { %v902_v18 = vadd.f32 0.5, %v901_v45 }
 0x859   :  { %v903_v40 = vsel %vm2179_vm4, %v1942_v14, %v902_v18 }
 0x85a   :  { %907 = vrot.lane.b32.xlu0 %v903_v40, %s2038_s6  ;;  %904 = vrot.lane.b32.xlu1 %v903_v40, %s2032_s15 }
 0x85e   :  { %965 = vrot.lane.b32.xlu0 %v961_v51, %s2038_s6  ;;  %962 = vrot.lane.b32.xlu1 %v961_v51, %s2032_s15 }
 0x862   :  { %969 = vrot.lane.b32.xlu0 %v961_v51, %s2037_s11  ;;  %911 = vrot.lane.b32.xlu1 %v903_v40, %s2037_s11 }
 0x8cc   :  { %v908_v26 = vpop.permute.xlu0 %907  ;;  %v905_v27 = vpop.permute.xlu1 %904 }
 0x8cd   :  { %v909_v16 = vmul.f32 %v908_v26, %v2506_v59  ;;  %v906_v35 = vmul.f32 %v905_v27, %v903_v40 }
 0x8cf   :  { %v2565_v38 = vadd.f32 %v909_v16, %v906_v35 }
 0x8d0   :  { %v966_v41 = vpop.permute.xlu0 %965  ;;  %v963_v42 = vpop.permute.xlu1 %962 }
 0x8d1   :  { %1943 = vtanh.f32 %v2565_v38  ;;  %v967_v43 = vmul.f32 %v966_v41, %v2510_v54  ;;  %v964_v52 = vmul.f32 %v963_v42, %v961_v51  ;;  %v1968_v54 = vld [vmem:[%s2712_s2] sm:$0xff]  }
 0x8d3   :  { %v2569_v63 = vadd.f32 %v967_v43, %v964_v52 }
 0x8d4   :  { %v912_v55 = vpop.permute.xlu1 %911  ;;  %v970_v59 = vpop.permute.xlu0 %969 }
 0x8d5   :  { %1945 = vtanh.f32 %v2569_v63 }
 0x8db   :  { %v1944_v53 = vpop.eup %1943 }
 0x8dc   :  { %v914_v56 = vmul.f32 %v1944_v53, %v912_v55 }
 0x8de   :  { %v974_v19 = vpack.c.bf16 %v914_v56, %v914_v56 }
 0x8df   :  { %v1946_v57 = vpop.eup %1945 }
 0x8e0   :  { %v972_v58 = vmul.f32 %v1946_v57, %v970_v59  ;;  %1007 = vmatprep.mubr.bf16.mxu1 %v974_v19 }
 0x8e2   :  { %v973_v21 = vpack.c.bf16 %v972_v58, %v972_v58 }
 0x8e4   :  { %1008 = vmatmul.mubr.bf16.vlgmr.msra.gmra.mrb[20].mxu1 %v973_v21  ;;  %1815 = vmatmul.mubr.bf16.vlgmr.msra.gmra.mrb[28].mxu0 %v973_v21  ;;  %v1979_v21 = vld [vmem:[#allocation2 + $0x28] sm:$0xff]  }
 0x8e5   :  { %1607 = vmatpush3.bf16.msra.mxu1 %v2572_v39  ;;  %1819 = vmatpush3.bf16.msra.mxu0 %v1968_v54 }
 0x8e6   :  { %1608 = vmatprep.subr.bf16.mxu1 %v2277_v49  ;;  %1820 = vmatprep.subr.bf16.mxu0 %v2035_v6  ;;  %v1972_v49 = vld [vmem:[%s2712_s2 + $0x10] sm:$0xff]  }
 0x8e7   :  { %1834 = vmatprep.mubr.msk.bf16.mxu0 %vm2036_vm5, %v2035_v6 }
 0x8e9   :  { %1609 = vmatpush3.bf16.msra.mxu1 %v2582_v60  ;;  %1821 = vmatpush3.bf16.msra.mxu0 %v1970_v4 }
 0x8ea   :  { %1610 = vmatprep.subr.bf16.mxu1 %v2295_v2  ;;  %1822 = vmatprep.subr.bf16.mxu0 %v2035_v6 }
 0x8ed   :  { %1611 = vmatpush3.bf16.msra.mxu1 %v2590_v5  ;;  %1823 = vmatpush3.bf16.msra.mxu0 %v1972_v49 }
 0x8ee   :  { %1612 = vmatprep.subr.bf16.mxu1 %v2299_v3  ;;  %1824 = vmatprep.subr.bf16.mxu0 %v2035_v6 }
 0x8f1   :  { %1613 = vmatpush3.bf16.msra.mxu1 %v2598_v7  ;;  %1825 = vmatpush3.bf16.msra.mxu0 %v1974_v8 }
 0x8f2   :  { %1614 = vmatprep.subr.bf16.mxu1 %v2303_v13  ;;  %1826 = vmatprep.subr.bf16.mxu0 %v2035_v6 }
 0x8f5   :  { %1615 = vmatpush3.bf16.msra.mxu1 %v2606_v9  ;;  %1827 = vmatpush3.bf16.msra.mxu0 %v1976_v10 }
 0x8f6   :  { %1616 = vmatprep.subr.bf16.mxu1 %v2307_v23  ;;  %1828 = vmatprep.subr.bf16.mxu0 %v2035_v6 }
 0x8f9   :  { %1617 = vmatpush3.bf16.msra.mxu1 %v2204_v28  ;;  %1829 = vmatpush3.bf16.msra.mxu0 %v2209_v29  ;;  %v2629_v28 = vld [vmem:[%s2713_s3] ss:$0 sm:$0xff] }
 0x8fa   :  { %1618 = vmatprep.subr.bf16.mxu1 %v2317_v31  ;;  %1830 = vmatprep.subr.bf16.mxu0 %v2035_v6  ;;  %v175_v29 = vadd.f32 %v2629_v28, %v2267_v44 }
 0x8fd   :  { %1619 = vmatpush3.bf16.msra.mxu1 %v2217_v32  ;;  %1831 = vmatpush3.bf16.msra.mxu0 %v2222_v33 }
 0x8fe   :  { %1620 = vmatprep.subr.bf16.mxu1 %v2323_v34  ;;  %1832 = vmatprep.subr.bf16.mxu0 %v2035_v6 }
 0x901   :  { %1621 = vmatpush3.bf16.msra.mxu1 %v2230_v36  ;;  %1833 = vmatpush3.bf16.msra.mxu0 %v2235_v37 }
 0x902   :  { %1637 = vmatprep.subr.bf16.mxu1 %v2275_v48  ;;  %1838 = vmatprep.subr.bf16.mxu0 %v2035_v6 }
 0x9b7   :  { %v1591_v32 = vpop.f32.mrb[20].mxu1  ;;  %v1066_v33 = vpop.f32.mrb[28].mxu0 }
 0x9b8   :  { %v1072_v11 = vadd.f32 %v1066_v33, %v175_v29  ;;  %v1592_v12 = vpop.f32.mrb[21].mxu1  ;;  %v1816_v24 = vpop.f32.mrb[29].mxu0 }
 0x9b9   :  { %v1593_v36 = vadd.f32 %v1592_v12, %v1591_v32  ;;  %v1594_v25 = vpop.f32.mrb[22].mxu1  ;;  %v1069_v37 = vpop.f32.mrb[30].mxu0 }
 0x9ba   :  { %v1073_v30 = vmul.f32 0.5, %v1072_v11  ;;  %v1595_v48 = vpop.f32.mrb[23].mxu1  ;;  %v1817_v61 = vpop.f32.mrb[31].mxu0 }
 0x9bb   :  { %v1010_v62 = vadd.f32 %v1593_v36, %v2286_v50 }
 0x9bc   :  { %v1074_v0 = vsel %vm2179_vm4, %v1072_v11, %v1073_v30 }
 0x9bd   :  { %v1015_v1 = vmul.f32 0.5, %v1010_v62  ;;  %1947 = vtanh.f32 %v1074_v0 }
 0x9bf   :  { %v1016_v44 = vsel %vm2179_vm4, %v1010_v62, %v1015_v1 }
 0x9c0   :  { %1949 = vtanh.f32 %v1016_v44 }
 0x9c7   :  { %v1948_v15 = vpop.eup %1947 }
 0x9c8   :  { %v1076_v45 = vmul.f32 0.5, %v1948_v15 }
 0x9ca   :  { %v1950_v47 = vpop.eup %1949  ;;  %v1077_v40 = vadd.f32 0.5, %v1076_v45 }
 0x9cb   :  { %v1018_v14 = vmul.f32 0.5, %v1950_v47 }
 0x9cc   :  { %v1078_v50 = vsel %vm2179_vm4, %v1948_v15, %v1077_v40 }
 0x9cd   :  { %v1019_v17 = vadd.f32 0.5, %v1018_v14 }
 0x9cf   :  { %v1020_v18 = vsel %vm2179_vm4, %v1950_v47, %v1019_v17 }
 0x9d0   :  { %1024 = vrot.lane.b32.xlu0 %v1020_v18, %s2038_s6  ;;  %1021 = vrot.lane.b32.xlu1 %v1020_v18, %s2032_s15 }
 0x9d4   :  { %1082 = vrot.lane.b32.xlu0 %v1078_v50, %s2038_s6  ;;  %1079 = vrot.lane.b32.xlu1 %v1078_v50, %s2032_s15 }
 0x9d8   :  { %1086 = vrot.lane.b32.xlu0 %v1078_v50, %s2037_s11  ;;  %1028 = vrot.lane.b32.xlu1 %v1020_v18, %s2037_s11 }
 0xa42   :  { %v1025_v22 = vpop.permute.xlu0 %1024  ;;  %v1022_v51 = vpop.permute.xlu1 %1021 }
 0xa43   :  { %v1026_v26 = vmul.f32 %v1025_v22, %v2565_v38  ;;  %v1023_v27 = vmul.f32 %v1022_v51, %v1020_v18 }
 0xa45   :  { %v2649_v16 = vadd.f32 %v1026_v26, %v1023_v27  ;;  %v1895_v27 = vld [vmem:[#allocation4] sm:$0xff]  }
 0xa46   :  { %v1083_v35 = vpop.permute.xlu0 %1082  ;;  %v1080_v41 = vpop.permute.xlu1 %1079 }
 0xa47   :  { %1951 = vtanh.f32 %v2649_v16  ;;  %v1084_v42 = vmul.f32 %v1083_v35, %v2569_v63  ;;  %v1081_v43 = vmul.f32 %v1080_v41, %v1078_v50  ;;  %v1978_v63 = vld [vmem:[#allocation2 + $0x48] sm:$0xff]   ;;  %v1897_v35 = vld [vmem:[#allocation4 + $0x10] sm:$0xff]  }
 0xa49   :  { %v2653_v52 = vadd.f32 %v1084_v42, %v1081_v43 }
 0xa4a   :  { %v1029_v55 = vpop.permute.xlu1 %1028  ;;  %v1087_v38 = vpop.permute.xlu0 %1086 }
 0xa4b   :  { %1953 = vtanh.f32 %v2653_v52 }
 0xa51   :  { %v1952_v53 = vpop.eup %1951 }
 0xa52   :  { %v1031_v56 = vmul.f32 %v1952_v53, %v1029_v55 }
 0xa54   :  { %v1091_v19 = vpack.c.bf16 %v1031_v56, %v1031_v56 }
 0xa55   :  { %v1954_v57 = vpop.eup %1953 }
 0xa56   :  { %v1089_v59 = vmul.f32 %v1954_v57, %v1087_v38  ;;  %1124 = vmatprep.mubr.bf16.mxu1 %v1091_v19  ;;  %v1898_v57 = vld [vmem:[#allocation4 + $0x18] sm:$0xff]   ;;  %v1899_v38 = vld [vmem:[#allocation4 + $0x20] sm:$0xff]  }
 0xa58   :  { %v1090_v58 = vpack.c.bf16 %v1089_v59, %v1089_v59  ;;  %v1900_v59 = vld [vmem:[#allocation4 + $0x28] sm:$0xff]  }
 0xa5a   :  { %1125 = vmatmul.mubr.bf16.vlgmr.msra.gmra.mrb[24].mxu1 %v1090_v58  ;;  %1835 = vmatmul.mubr.bf16.vlgmr.msra.gmra.mrb[32].mxu0 %v1090_v58 }
 0xa5b   :  { %1638 = vmatpush3.bf16.msra.mxu1 %v2572_v39  ;;  %1854 = vmatprep.mubr.msk.bf16.mxu0 %vm2036_vm5, %v2035_v6  ;;  %v1980_v39 = vld [vmem:[#allocation2 + $0x30] sm:$0xff]  }
 0xa5c   :  { %1639 = vmatprep.subr.bf16.mxu1 %v1978_v63  ;;  %1839 = vmatpush3.bf16.msra.mxu0 %v1895_v27 }
 0xa5d   :  { %1840 = vmatprep.subr.bf16.mxu0 %v2035_v6 }
 0xa5f   :  { %1640 = vmatpush3.bf16.msra.mxu1 %v2582_v60 }
 0xa60   :  { %1641 = vmatprep.subr.bf16.mxu1 %v2295_v2  ;;  %v1981_v2 = vld [vmem:[#allocation2 + $0x38] sm:$0xff]  }
 0xa63   :  { %1642 = vmatpush3.bf16.msra.mxu1 %v2590_v5 }
 0xa64   :  { %1643 = vmatprep.subr.bf16.mxu1 %v2299_v3  ;;  %v178_v3 = vadd.f32 %v2629_v28, %v2271_v46 }
 0xa67   :  { %1644 = vmatpush3.bf16.msra.mxu1 %v2598_v7 }
 0xa68   :  { %1645 = vmatprep.subr.bf16.mxu1 %v2303_v13 }
 0xa6b   :  { %1646 = vmatpush3.bf16.msra.mxu1 %v2606_v9 }
 0xa6c   :  { %1647 = vmatprep.subr.bf16.mxu1 %v2307_v23 }
 0xa6f   :  { %1648 = vmatpush3.bf16.msra.mxu1 %v1979_v21 }
 0xa70   :  { %1649 = vmatprep.subr.bf16.mxu1 %v2317_v31 }
 0xa73   :  { %1650 = vmatpush3.bf16.msra.mxu1 %v1980_v39  ;;  %v1901_v39 = vld [vmem:[#allocation4 + $0x30] sm:$0xff]  }
 0xa74   :  { %1651 = vmatprep.subr.bf16.mxu1 %v2323_v34  ;;  %v1982_v34 = vld [vmem:[%s2715_s5] ss:$0 sm:$0xff] }
 0xa77   :  { %1652 = vmatpush3.bf16.msra.mxu1 %v1981_v2 }
 0xb2d   :  { %v1622_v54 = vpop.f32.mrb[24].mxu1  ;;  %v1183_v60 = vpop.f32.mrb[32].mxu0 }
 0xb2e   :  { %v1189_v13 = vadd.f32 %v1183_v60, %v178_v3  ;;  %v1623_v4 = vpop.f32.mrb[25].mxu1  ;;  %v1836_v5 = vpop.f32.mrb[33].mxu0  ;;  %v1902_v3 = vld [vmem:[#allocation4 + $0x38] sm:$0xff]  }
 0xb2f   :  { %v1624_v49 = vadd.f32 %v1623_v4, %v1622_v54  ;;  %v1625_v23 = vpop.f32.mrb[26].mxu1  ;;  %v1186_v7 = vpop.f32.mrb[34].mxu0 }
 0xb30   :  { %v1190_v8 = vmul.f32 0.5, %v1189_v13  ;;  %v1626_v9 = vpop.f32.mrb[27].mxu1  ;;  %v1837_v31 = vpop.f32.mrb[35].mxu0 }
 0xb31   :  { %v1127_v10 = vadd.f32 %v1982_v34, %v1624_v49 }
 0xb32   :  { %v1191_v29 = vsel %vm2179_vm4, %v1189_v13, %v1190_v8  ;;  %v1419_v8 = vld [vmem:[%s2717_s7] ss:$0 sm:$0xff] }
 0xb33   :  { %v1132_v46 = vmul.f32 0.5, %v1127_v10  ;;  %1955 = vtanh.f32 %v1191_v29 }
 0xb35   :  { %v1133_v28 = vsel %vm2179_vm4, %v1127_v10, %v1132_v46 }
 0xb36   :  { %1957 = vtanh.f32 %v1133_v28 }
 0xb3d   :  { %v1956_v32 = vpop.eup %1955 }
 0xb3e   :  { %v1193_v12 = vmul.f32 0.5, %v1956_v32 }
 0xb40   :  { %v1958_v33 = vpop.eup %1957  ;;  %v1194_v25 = vadd.f32 0.5, %v1193_v12 }
 0xb41   :  { %v1135_v11 = vmul.f32 0.5, %v1958_v33 }
 0xb42   :  { %v1195_v37 = vsel %vm2179_vm4, %v1956_v32, %v1194_v25 }
 0xb43   :  { %v1136_v24 = vadd.f32 0.5, %v1135_v11 }
 0xb45   :  { %v1137_v36 = vsel %vm2179_vm4, %v1958_v33, %v1136_v24 }
 0xb46   :  { %1141 = vrot.lane.b32.xlu0 %v1137_v36, %s2038_s6  ;;  %1138 = vrot.lane.b32.xlu1 %v1137_v36, %s2032_s15 }
 0xb4a   :  { %1199 = vrot.lane.b32.xlu0 %v1195_v37, %s2038_s6  ;;  %1196 = vrot.lane.b32.xlu1 %v1195_v37, %s2032_s15 }
 0xb4e   :  { %1203 = vrot.lane.b32.xlu0 %v1195_v37, %s2037_s11  ;;  %1145 = vrot.lane.b32.xlu1 %v1137_v36, %s2037_s11 }
 0xbb8   :  { %v1142_v30 = vpop.permute.xlu0 %1141  ;;  %v1139_v48 = vpop.permute.xlu1 %1138 }
 0xbb9   :  { %v1143_v61 = vmul.f32 %v1142_v30, %v2649_v16  ;;  %v1140_v62 = vmul.f32 %v1139_v48, %v1137_v36  ;;  %v1896_v16 = vld [vmem:[#allocation4 + $0x8] sm:$0xff]  }
 0xbba   :  { %1841 = vmatpush3.bf16.msra.mxu0 %v1896_v16 }
 0xbbb   :  { %v1144_v0 = vadd.f32 %v1143_v61, %v1140_v62  ;;  %1842 = vmatprep.subr.bf16.mxu0 %v2035_v6 }
 0xbbc   :  { %v1200_v1 = vpop.permute.xlu0 %1199  ;;  %v1197_v44 = vpop.permute.xlu1 %1196 }
 0xbbd   :  { %1959 = vtanh.f32 %v1144_v0  ;;  %v1201_v15 = vmul.f32 %v1200_v1, %v2653_v52  ;;  %v1198_v47 = vmul.f32 %v1197_v44, %v1195_v37 }
 0xbbe   :  { %1843 = vmatpush3.bf16.msra.mxu0 %v1897_v35 }
 0xbbf   :  { %v1202_v14 = vadd.f32 %v1201_v15, %v1198_v47  ;;  %1844 = vmatprep.subr.bf16.mxu0 %v2035_v6 }
 0xbc0   :  { %v1146_v17 = vpop.permute.xlu1 %1145  ;;  %v1204_v22 = vpop.permute.xlu0 %1203 }
 0xbc1   :  { %1961 = vtanh.f32 %v1202_v14 }
 0xbc2   :  { %1845 = vmatpush3.bf16.msra.mxu0 %v1898_v57 }
 0xbc3   :  { %1846 = vmatprep.subr.bf16.mxu0 %v2035_v6 }
 0xbc6   :  { %1847 = vmatpush3.bf16.msra.mxu0 %v1899_v38 }
 0xbc7   :  { %v1960_v45 = vpop.eup %1959  ;;  %1848 = vmatprep.subr.bf16.mxu0 %v2035_v6 }
 0xbc8   :  { %v1148_v18 = vmul.f32 %v1960_v45, %v1146_v17 }
 0xbca   :  { %v1208_v40 = vpack.c.bf16 %v1148_v18, %v1148_v18  ;;  %1849 = vmatpush3.bf16.msra.mxu0 %v1900_v59 }
 0xbcb   :  { %v1962_v50 = vpop.eup %1961  ;;  %1850 = vmatprep.subr.bf16.mxu0 %v2035_v6 }
 0xbcc   :  { %v1206_v51 = vmul.f32 %v1962_v50, %v1204_v22  ;;  %1241 = vmatprep.mubr.bf16.mxu1 %v1208_v40 }
 0xbce   :  { %v1207_v26 = vpack.c.bf16 %v1206_v51, %v1206_v51  ;;  %1851 = vmatpush3.bf16.msra.mxu0 %v1901_v39 }
 0xbcf   :  { %1852 = vmatprep.subr.bf16.mxu0 %v2035_v6 }
 0xbd0   :  { %1242 = vmatmul.mubr.bf16.vlgmr.msra.gmra.mrb[28].mxu1 %v1207_v26 }
 0xbd2   :  { %1853 = vmatpush3.bf16.msra.mxu0 %v1902_v3 }
 0xca3   :  { %v1653_v41 = vpop.f32.mrb[28].mxu1 }
 0xca4   :  { %v1654_v42 = vpop.f32.mrb[29].mxu1 }
 0xca5   :  { %v1655_v43 = vadd.f32 %v1654_v42, %v1653_v41  ;;  %v1656_v52 = vpop.f32.mrb[30].mxu1 }
 0xca6   :  { %v1657_v53 = vpop.f32.mrb[31].mxu1 }
 0xca7   :  { %v1244_v55 = vadd.f32 %v1982_v34, %v1655_v43 }
 0xca9   :  { %v1249_v56 = vmul.f32 0.5, %v1244_v55 }
 0xcab   :  { %v1250_v19 = vsel %vm2179_vm4, %v1244_v55, %v1249_v56 }
 0xcac   :  { %1963 = vtanh.f32 %v1250_v19 }
 0xcb6   :  { %v1964_v58 = vpop.eup %1963 }
 0xcb7   :  { %v1252_v63 = vmul.f32 0.5, %v1964_v58 }
 0xcb9   :  { %v1253_v21 = vadd.f32 0.5, %v1252_v63 }
 0xcbb   :  { %v1254_v2 = vsel %vm2179_vm4, %v1964_v58, %v1253_v21 }
 0xcbc   :  { %1258 = vrot.lane.b32.xlu0 %v1254_v2, %s2038_s6  ;;  %1255 = vrot.lane.b32.xlu1 %v1254_v2, %s2032_s15 }
 0xcc0   :  { %1262 = vrot.lane.b32.xlu1 %v1254_v2, %s2037_s11 }
 0xd2e   :  { %v1259_v54 = vpop.permute.xlu0 %1258  ;;  %v1256_v60 = vpop.permute.xlu1 %1255 }
 0xd2f   :  { %v1260_v13 = vmul.f32 %v1259_v54, %v1144_v0  ;;  %v1257_v4 = vmul.f32 %v1256_v60, %v1254_v2 }
 0xd31   :  { %v1261_v5 = vadd.f32 %v1260_v13, %v1257_v4 }
 0xd32   :  { %v1263_v20 = vpop.permute.xlu1 %1262 }
 0xd33   :  { %1965 = vtanh.f32 %v1261_v5 }
 0xd3d   :  { %v1966_v49 = vpop.eup %1965 }
 0xd3e   :  { %v1265_v23 = vmul.f32 %v1966_v49, %v1263_v20 }
 0xd40   :  { %v1266_v7 = vpack.c.bf16 %v1265_v23, %v1265_v23 }
 0xd42   :  { %1855 = vmatmul.mubr.bf16.vlgmr.msra.gmra.mrb[36].mxu0 %v1266_v7 }
 0xe15   :  { %v1372_v6 = vpop.f32.mrb[36].mxu0 }
 0xe16   :  { %v1373_v9 = vadd.f32 %v1419_v8, %v1372_v6  ;;  %v1856_v31 = vpop.f32.mrb[37].mxu0 }
 0xe17   :  { %v1375_v34 = vpop.f32.mrb[38].mxu0 }
 0xe18   :  { %1378 = vst [vmem:[%s2718_s8] sm:$0xff] %v1373_v9  ;;  %v1857_v10 = vpop.f32.mrb[39].mxu0 }
 0xe19   :  { %1383 = vsyncpa [#allocation3], 1 }
 0xe1a   :  { %1384 = vsyncpa [#allocation5], 1 }

</bundles_post_ra>
